<compile_context>
chip_gen: v6e
topology: v6e:2x2x1
jax: 0.10.0
libtpu: 0.0.40
codegen_flags: <defaults>
</compile_context>

<pallas_src>
import math
import numpy as np
import jax
import jax.numpy as jnp
from jax import lax
from jax.experimental import pallas as pl
from jax.experimental.pallas import tpu as pltpu

# ---- small synthetic configuration (module defaults are dim=768, hidden=1536, heads=16) ----
B = 2            # batch
N = 8            # num tokens
DIM = 128        # embed dim (lane-dense)
HIDDEN = 256     # MLP hidden dim (lane-dense)
HEADS = 4        # num heads
HEAD_DIM = DIM // HEADS
EPS = 1e-12      # LayerNorm eps (matches nn.LayerNorm(dim, eps=1e-12))
SCALE = 1.0 / math.sqrt(HEAD_DIM)
_SQRT1_2 = 1.0 / math.sqrt(2.0)

assert HIDDEN >= DIM, "packed-vector layout assumes HIDDEN >= DIM"

# Row layout of the packed small-vector buffer (one (8, HIDDEN) f32 array, one DMA).
ROW_BP, ROW_G1, ROW_BE1, ROW_G2, ROW_BE2, ROW_BB2, ROW_BB1 = range(7)


# ----------------------------- in-kernel math helpers -----------------------------
def _recip(x):
    """EUP approx reciprocal + one Newton-Raphson step (VPU FMA) -> ~f32 accuracy, no VALU divide."""
    r = pl.reciprocal(x, approx=True)
    return r * (2.0 - x * r)


def _nr_rsqrt(x):
    """rsqrt + one Newton-Raphson step -> accuracy independent of the HW approximation quality."""
    r = lax.rsqrt(x)
    return r * (1.5 - 0.5 * x * r * r)


def _erf_approx(z):
    # Abramowitz & Stegun 7.1.26 polynomial, |err| < 1.5e-7 (exact-GELU erf surrogate).
    a1, a2, a3, a4, a5 = 0.254829592, -0.284496736, 1.421413741, -1.453152027, 1.061405429
    pcoef = 0.3275911
    sgn = jnp.where(z >= 0.0, 1.0, -1.0)
    az = jnp.abs(z)
    t = _recip(1.0 + pcoef * az)
    poly = ((((a5 * t + a4) * t + a3) * t + a2) * t + a1) * t
    return sgn * (1.0 - poly * jnp.exp(-az * az))


def _gelu_exact(z):
    # PyTorch nn.GELU() default (erf-based, not tanh approximation).
    return 0.5 * z * (1.0 + _erf_approx(z * _SQRT1_2))


def _layernorm(x, gamma, beta):
    mu = jnp.mean(x, axis=-1, keepdims=True)
    xc = x - mu
    var = jnp.mean(xc * xc, axis=-1, keepdims=True)
    return xc * _nr_rsqrt(var + EPS) * gamma + beta


# ----------------------------------- kernel -----------------------------------
def encoder_kernel(x_ref, wqkv_ref, wp_ref, w1_ref, w2_ref, vec_ref, o_ref):
    BB, Nx, Dx = x_ref.shape
    HD = Dx // HEADS
    rows = BB * Nx
    bf16, f32 = jnp.bfloat16, jnp.float32

    # One DMA for all small per-channel vectors (f32).
    vecs = vec_ref[...]                                # (8, HIDDEN)
    bp = vecs[ROW_BP:ROW_BP + 1, :Dx]
    g1 = vecs[ROW_G1:ROW_G1 + 1, :Dx]
    be1 = vecs[ROW_BE1:ROW_BE1 + 1, :Dx]
    g2 = vecs[ROW_G2:ROW_G2 + 1, :Dx]
    be2 = vecs[ROW_BE2:ROW_BE2 + 1, :Dx]
    bb2 = vecs[ROW_BB2:ROW_BB2 + 1, :Dx]
    bb1 = vecs[ROW_BB1:ROW_BB1 + 1, :]

    x = x_ref[...]                                     # (BB, N, D) f32
    x2 = x.reshape(rows, Dx)
    xb = x2.astype(bf16)

    # ---- fused QKV projection (scale folded into Q columns): bf16 x bf16 -> f32 on the MXU ----
    qkv = jnp.dot(xb, wqkv_ref[...], preferred_element_type=f32)            # (rows, 3D)

    # Single head relayout on the packed qkv tensor, then free static slices for q/k/v.
    qkv_h = qkv.reshape(BB, Nx, 3 * HEADS, HD).transpose(0, 2, 1, 3)        # (BB, 3H, N, HD)
    q = qkv_h[:, 0 * HEADS:1 * HEADS].reshape(BB * HEADS, Nx, HD)           # pre-scaled
    k = qkv_h[:, 1 * HEADS:2 * HEADS].reshape(BB * HEADS, Nx, HD)
    v = qkv_h[:, 2 * HEADS:3 * HEADS].reshape(BB * HEADS, Nx, HD)

    # ---- scaled dot-product attention, batched over (batch*heads), bf16 operands / f32 accum ----
    s = jnp.einsum('bqd,bkd->bqk', q.astype(bf16), k.astype(bf16),
                   preferred_element_type=f32)                              # (BB*H, N, N)
    s = s - jnp.max(s, axis=-1, keepdims=True)
    p = jnp.exp(s)
    p = p * _recip(jnp.sum(p, axis=-1, keepdims=True))                      # softmax (attn_drop = identity, eval)
    ctx = jnp.einsum('bqk,bkd->bqd', p.astype(bf16), v.astype(bf16),
                     preferred_element_type=f32)                            # (BB*H, N, HD)

    # == output.transpose(1,2).reshape(B, N, D) in the torch module
    ctx = ctx.reshape(BB, HEADS, Nx, HD).transpose(0, 2, 1, 3).reshape(rows, Dx)

    attn = jnp.dot(ctx.astype(bf16), wp_ref[...], preferred_element_type=f32) + bp

    # ---- residual + LayerNorm1 (encoder dropout = identity in eval) ----
    x1 = _layernorm(x2 + attn, g1, be1)

    # ---- MLP: Linear -> GELU -> Linear (dropout = identity in eval) ----
    h1 = jnp.dot(x1.astype(bf16), w1_ref[...], preferred_element_type=f32) + bb1
    h1 = _gelu_exact(h1)
    mlp = jnp.dot(h1.astype(bf16), w2_ref[...], preferred_element_type=f32) + bb2

    # ---- residual + LayerNorm2 ----
    out = _layernorm(x1 + mlp, g2, be2)
    o_ref[...] = out.reshape(BB, Nx, Dx).astype(o_ref.dtype)


# ----------------------------------- wrappers -----------------------------------
def prepare_params(params):
    """One-time parameter prep: fuse QKV (+fold attention scale), cast matmul weights to bf16,
    pack all small per-channel vectors into a single (8, HIDDEN) f32 buffer."""
    wq, wk, wv, wp, bp, g1, be1, g2, be2, w1, bb1, w2, bb2 = params
    wqkv = jnp.concatenate([wq * SCALE, wk, wv], axis=1).astype(jnp.bfloat16)   # (D, 3D)
    vecs = jnp.zeros((8, HIDDEN), jnp.float32)
    vecs = vecs.at[ROW_BP, :DIM].set(bp.reshape(-1))
    vecs = vecs.at[ROW_G1, :DIM].set(g1.reshape(-1))
    vecs = vecs.at[ROW_BE1, :DIM].set(be1.reshape(-1))
    vecs = vecs.at[ROW_G2, :DIM].set(g2.reshape(-1))
    vecs = vecs.at[ROW_BE2, :DIM].set(be2.reshape(-1))
    vecs = vecs.at[ROW_BB2, :DIM].set(bb2.reshape(-1))
    vecs = vecs.at[ROW_BB1, :].set(bb1.reshape(-1))
    return (wqkv,
            wp.astype(jnp.bfloat16),
            w1.astype(jnp.bfloat16),
            w2.astype(jnp.bfloat16),
            vecs)


def encoder_forward(x, kparams, *, batch_block=None):
    wqkv, wp, w1, w2, vecs = kparams
    Bx, Nx, Dx = x.shape

    if batch_block is None:
        # Aim for >= 128 token rows per grid tile (fills MXU sublanes on v5e; a real deployment
        # would target 256+ for v6e/v7x), capped at the full batch. At this toy size this
        # degenerates to a single grid step.
        batch_block = min(Bx, max(1, -(-128 // Nx)))
    assert Bx % batch_block == 0, "toy wrapper assumes batch divides the batch block"
    grid = (Bx // batch_block,)

    const2 = lambda i: (0, 0)
    grid_spec = pltpu.PrefetchScalarGridSpec(
        num_scalar_prefetch=0,
        grid=grid,
        in_specs=[
            pl.BlockSpec((batch_block, Nx, Dx), lambda i: (i, 0, 0)),   # x: pipelined tiles
            pl.BlockSpec(wqkv.shape, const2),                           # weights: constant index_map
            pl.BlockSpec(wp.shape, const2),                             #  -> DMA'd once, VMEM-resident
            pl.BlockSpec(w1.shape, const2),
            pl.BlockSpec(w2.shape, const2),
            pl.BlockSpec(vecs.shape, const2),
        ],
        out_specs=pl.BlockSpec((batch_block, Nx, Dx), lambda i: (i, 0, 0)),
    )
    return pl.pallas_call(
        encoder_kernel,
        out_shape=jax.ShapeDtypeStruct(x.shape, x.dtype),
        grid_spec=grid_spec,
        compiler_params=pltpu.CompilerParams(
            dimension_semantics=("parallel",),          # token/batch axis -> both TCs on v7x
            vmem_limit_bytes=32 * 1024 * 1024,          # explicit scoped-VMEM budget (<= all gens)
        ),
    )(x, wqkv, wp, w1, w2, vecs)


# ----------------------------------- references -----------------------------------
def encoder_ref_f32(x, params):
    """Pure-JAX f32 reference mirroring the PyTorch forward exactly (eval mode)."""
    wq, wk, wv, wp, bp, g1, be1, g2, be2, w1, bb1, w2, bb2 = params
    Bx, Nx, Dx = x.shape
    q = (x @ wq).reshape(Bx, Nx, HEADS, HEAD_DIM).transpose(0, 2, 1, 3)
    k = (x @ wk).reshape(Bx, Nx, HEADS, HEAD_DIM).transpose(0, 2, 1, 3)
    v = (x @ wv).reshape(Bx, Nx, HEADS, HEAD_DIM).transpose(0, 2, 1, 3)
    attn = jax.nn.softmax((q @ k.transpose(0, 1, 3, 2)) * SCALE, axis=-1)
    ctx = (attn @ v).transpose(0, 2, 1, 3).reshape(Bx, Nx, Dx)
    attn_out = ctx @ wp + bp

    def ln(z, g, be):
        mu = jnp.mean(z, axis=-1, keepdims=True)
        var = jnp.mean((z - mu) ** 2, axis=-1, keepdims=True)
        return (z - mu) / jnp.sqrt(var + EPS) * g + be

    x1 = ln(x + attn_out, g1, be1)
    h1 = jax.nn.gelu(x1 @ w1 + bb1, approximate=False)
    return ln(x1 + (h1 @ w2 + bb2), g2, be2)


def encoder_ref_mixed(x, kparams):
    """Pure-JAX mirror of the kernel's mixed-precision policy (bf16 MXU operands, f32 accum,
    f32 softmax/LayerNorm/GELU) with exact divides/erf — for the tight structural check."""
    wqkv, wp, w1, w2, vecs = kparams
    bf16, f32 = jnp.bfloat16, jnp.float32
    bp = vecs[ROW_BP:ROW_BP + 1, :DIM]
    g1 = vecs[ROW_G1:ROW_G1 + 1, :DIM]
    be1 = vecs[ROW_BE1:ROW_BE1 + 1, :DIM]
    g2 = vecs[ROW_G2:ROW_G2 + 1, :DIM]
    be2 = vecs[ROW_BE2:ROW_BE2 + 1, :DIM]
    bb2 = vecs[ROW_BB2:ROW_BB2 + 1, :DIM]
    bb1 = vecs[ROW_BB1:ROW_BB1 + 1, :]

    Bx, Nx, Dx = x.shape
    HD = Dx // HEADS
    x2 = x.reshape(Bx * Nx, Dx)
    qkv = jnp.dot(x2.astype(bf16), wqkv, preferred_element_type=f32)
    qkv_h = qkv.reshape(Bx, Nx, 3 * HEADS, HD).transpose(0, 2, 1, 3)
    q = qkv_h[:, 0 * HEADS:1 * HEADS].reshape(Bx * HEADS, Nx, HD)
    k = qkv_h[:, 1 * HEADS:2 * HEADS].reshape(Bx * HEADS, Nx, HD)
    v = qkv_h[:, 2 * HEADS:3 * HEADS].reshape(Bx * HEADS, Nx, HD)
    s = jnp.einsum('bqd,bkd->bqk', q.astype(bf16), k.astype(bf16), preferred_element_type=f32)
    s = s - jnp.max(s, axis=-1, keepdims=True)
    p = jnp.exp(s)
    p = p / jnp.sum(p, axis=-1, keepdims=True)
    ctx = jnp.einsum('bqk,bkd->bqd', p.astype(bf16), v.astype(bf16), preferred_element_type=f32)
    ctx = ctx.reshape(Bx, HEADS, Nx, HD).transpose(0, 2, 1, 3).reshape(Bx * Nx, Dx)
    attn = jnp.dot(ctx.astype(bf16), wp, preferred_element_type=f32) + bp

    def ln(z, g, be):
        mu = jnp.mean(z, axis=-1, keepdims=True)
        var = jnp.mean((z - mu) ** 2, axis=-1, keepdims=True)
        return (z - mu) / jnp.sqrt(var + EPS) * g + be

    x1 = ln(x2 + attn, g1, be1)
    h1 = jnp.dot(x1.astype(bf16), w1, preferred_element_type=f32) + bb1
    h1 = jax.nn.gelu(h1, approximate=False)
    mlp = jnp.dot(h1.astype(bf16), w2, preferred_element_type=f32) + bb2
    return ln(x1 + mlp, g2, be2).reshape(Bx, Nx, Dx)


def make_params(key):
    ks = jax.random.split(key, 8)
    s = 0.05
    wq = s * jax.random.normal(ks[0], (DIM, DIM), jnp.float32)      # to_qkv (q rows), transposed
    wk = s * jax.random.normal(ks[1], (DIM, DIM), jnp.float32)      # to_qkv (k rows), transposed
    wv = s * jax.random.normal(ks[2], (DIM, DIM), jnp.float32)      # to_qkv (v rows), transposed
    wp = s * jax.random.normal(ks[3], (DIM, DIM), jnp.float32)      # proj weight, transposed
    bp = s * jax.random.normal(ks[4], (1, DIM), jnp.float32)        # proj bias
    g1 = jnp.ones((1, DIM), jnp.float32)                            # LayerNorm1 gamma
    be1 = jnp.zeros((1, DIM), jnp.float32)                          # LayerNorm1 beta
    g2 = jnp.ones((1, DIM), jnp.float32)                            # LayerNorm2 gamma
    be2 = jnp.zeros((1, DIM), jnp.float32)                          # LayerNorm2 beta
    w1 = s * jax.random.normal(ks[5], (DIM, HIDDEN), jnp.float32)   # MLP fc1, transposed
    bb1 = s * jax.random.normal(ks[6], (1, HIDDEN), jnp.float32)    # MLP fc1 bias
    w2 = s * jax.random.normal(ks[7], (HIDDEN, DIM), jnp.float32)   # MLP fc2, transposed
    bb2 = jnp.zeros((1, DIM), jnp.float32)                          # MLP fc2 bias
    return (wq, wk, wv, wp, bp, g1, be1, g2, be2, w1, bb1, w2, bb2)


if __name__ == "__main__":
    key = jax.random.PRNGKey(0)
    kx, kp = jax.random.split(key)
    x = jax.random.normal(kx, (B, N, DIM), jnp.float32)
    params = make_params(kp)

    # One-time parameter prep (QKV fusion + scale fold + bf16 cast + small-vector packing).
    kparams = prepare_params(params)

    fwd = jax.jit(lambda xx: encoder_forward(xx, kparams))
    out = jax.block_until_ready(fwd(x))

    # Tight check vs an exact-math mirror of the kernel's own precision policy
    # (tolerance covers sub-ulp bf16 re-quantization flips of intermediates).
    ref_mixed = encoder_ref_mixed(x, kparams)
    np.testing.assert_allclose(np.asarray(out), np.asarray(ref_mixed), rtol=2e-3, atol=2e-3)

    # Semantic check vs the f32 PyTorch-faithful reference; the gap is dominated by the
    # intentional bf16 MXU-operand quantization (per perf review), not by approximations.
    ref_f32 = encoder_ref_f32(x, params)
    np.testing.assert_allclose(np.asarray(out), np.asarray(ref_f32), rtol=2e-2, atol=2e-2)

    print("KERNEL_OK")
</pallas_src>

<mosaic_0001>
module attributes {stable_mosaic.version = 11 : i64} {
  func.func @encoder_kernel(%arg0: i32, %arg1: memref<2x8x128xf32, #tpu.memory_space<vmem>>, %arg2: memref<128x384xbf16, #tpu.memory_space<vmem>>, %arg3: memref<128x128xbf16, #tpu.memory_space<vmem>>, %arg4: memref<128x256xbf16, #tpu.memory_space<vmem>>, %arg5: memref<256x128xbf16, #tpu.memory_space<vmem>>, %arg6: memref<8x256xf32, #tpu.memory_space<vmem>>, %arg7: memref<2x8x128xf32, #tpu.memory_space<vmem>>) attributes {dimension_semantics = [#tpu.dimension_semantics<parallel>], iteration_bounds = array<i64: 1>, scalar_prefetch = 0 : i64, scratch_operands = 0 : i64, tpu.core_type = #tpu.core_type<tc>, window_params = [{transform_indices = @transform_0, window_bounds = array<i64: 2, 8, 128>}, {pipeline_mode = #tpu.pipeline_mode<synchronous>, transform_indices = @transform_1, window_bounds = array<i64: 128, 384>}, {pipeline_mode = #tpu.pipeline_mode<synchronous>, transform_indices = @transform_2, window_bounds = array<i64: 128, 128>}, {pipeline_mode = #tpu.pipeline_mode<synchronous>, transform_indices = @transform_3, window_bounds = array<i64: 128, 256>}, {pipeline_mode = #tpu.pipeline_mode<synchronous>, transform_indices = @transform_4, window_bounds = array<i64: 256, 128>}, {pipeline_mode = #tpu.pipeline_mode<synchronous>, transform_indices = @transform_5, window_bounds = array<i64: 8, 256>}, {transform_indices = @transform_6, window_bounds = array<i64: 2, 8, 128>}]} {
    %c0 = arith.constant 0 : index
    %c0_0 = arith.constant 0 : index
    %0 = vector.load %arg6[%c0, %c0_0] : memref<8x256xf32, #tpu.memory_space<vmem>>, vector<8x256xf32>
    %1 = vector.extract_strided_slice %0 {offsets = [0, 0], sizes = [1, 128], strides = [1, 1]} : vector<8x256xf32> to vector<1x128xf32>
    %2 = vector.extract_strided_slice %0 {offsets = [1, 0], sizes = [1, 128], strides = [1, 1]} : vector<8x256xf32> to vector<1x128xf32>
    %3 = vector.extract_strided_slice %0 {offsets = [2, 0], sizes = [1, 128], strides = [1, 1]} : vector<8x256xf32> to vector<1x128xf32>
    %4 = vector.extract_strided_slice %0 {offsets = [3, 0], sizes = [1, 128], strides = [1, 1]} : vector<8x256xf32> to vector<1x128xf32>
    %5 = vector.extract_strided_slice %0 {offsets = [4, 0], sizes = [1, 128], strides = [1, 1]} : vector<8x256xf32> to vector<1x128xf32>
    %6 = vector.extract_strided_slice %0 {offsets = [5, 0], sizes = [1, 128], strides = [1, 1]} : vector<8x256xf32> to vector<1x128xf32>
    %7 = vector.extract_strided_slice %0 {offsets = [6, 0], sizes = [1, 256], strides = [1, 1]} : vector<8x256xf32> to vector<1x256xf32>
    %c0_1 = arith.constant 0 : index
    %c0_2 = arith.constant 0 : index
    %c0_3 = arith.constant 0 : index
    %8 = vector.load %arg1[%c0_1, %c0_2, %c0_3] : memref<2x8x128xf32, #tpu.memory_space<vmem>>, vector<2x8x128xf32>
    %9 = vector.shape_cast %8 : vector<2x8x128xf32> to vector<16x128xf32>
    %10 = arith.truncf %9 : vector<16x128xf32> to vector<16x128xbf16>
    %c0_4 = arith.constant 0 : index
    %c0_5 = arith.constant 0 : index
    %11 = vector.load %arg2[%c0_4, %c0_5] : memref<128x384xbf16, #tpu.memory_space<vmem>>, vector<128x384xbf16>
    %cst = arith.constant dense<0.000000e+00> : vector<16x384xf32>
    %12 = tpu.matmul %10, %11, %cst {dimension_numbers = #tpu.dot_dimension_numbers<[1], [0], [0], [1], [0, 0, 1, 1], [], []>} : vector<16x128xbf16>, vector<128x384xbf16>, vector<16x384xf32> -> vector<16x384xf32>
    %13 = vector.shape_cast %12 : vector<16x384xf32> to vector<2x8x12x32xf32>
    %14 = tpu.transpose %13, [0, 2, 1, 3] : vector<2x8x12x32xf32> -> vector<2x12x8x32xf32>
    %15 = vector.extract_strided_slice %14 {offsets = [0, 0, 0, 0], sizes = [2, 4, 8, 32], strides = [1, 1, 1, 1]} : vector<2x12x8x32xf32> to vector<2x4x8x32xf32>
    %16 = vector.shape_cast %15 : vector<2x4x8x32xf32> to vector<8x8x32xf32>
    %17 = vector.extract_strided_slice %14 {offsets = [0, 4, 0, 0], sizes = [2, 4, 8, 32], strides = [1, 1, 1, 1]} : vector<2x12x8x32xf32> to vector<2x4x8x32xf32>
    %18 = vector.shape_cast %17 : vector<2x4x8x32xf32> to vector<8x8x32xf32>
    %19 = vector.extract_strided_slice %14 {offsets = [0, 8, 0, 0], sizes = [2, 4, 8, 32], strides = [1, 1, 1, 1]} : vector<2x12x8x32xf32> to vector<2x4x8x32xf32>
    %20 = vector.shape_cast %19 : vector<2x4x8x32xf32> to vector<8x8x32xf32>
    %21 = arith.truncf %16 : vector<8x8x32xf32> to vector<8x8x32xbf16>
    %22 = arith.truncf %18 : vector<8x8x32xf32> to vector<8x8x32xbf16>
    "tpu.trace_start"() <{level = 10 : i32, message = "bqd,bkd->bqk"}> : () -> ()
    %cst_6 = arith.constant dense<0.000000e+00> : vector<8x8x8xf32>
    %23 = tpu.matmul %21, %22, %cst_6 {dimension_numbers = #tpu.dot_dimension_numbers<[2], [2], [1], [1], [0, 0, 0, 1, 1, 1], [0], [0]>} : vector<8x8x32xbf16>, vector<8x8x32xbf16>, vector<8x8x8xf32> -> vector<8x8x8xf32>
    "tpu.trace_stop"() : () -> ()
    %cst_7 = arith.constant dense<0xFF800000> : vector<8x8xf32>
    %24 = vector.multi_reduction <maximumf>, %23, %cst_7 [2] : vector<8x8x8xf32> to vector<8x8xf32>
    %25 = vector.shape_cast %24 : vector<8x8xf32> to vector<8x8x1xf32>
    %26 = vector.broadcast %25 : vector<8x8x1xf32> to vector<8x8x8xf32>
    %27 = arith.subf %23, %26 : vector<8x8x8xf32>
    %28 = math.exp %27 : vector<8x8x8xf32>
    %cst_8 = arith.constant dense<0.000000e+00> : vector<8x8xf32>
    %29 = vector.multi_reduction <add>, %28, %cst_8 [2] : vector<8x8x8xf32> to vector<8x8xf32>
    %30 = vector.shape_cast %29 : vector<8x8xf32> to vector<8x8x1xf32>
    %31 = tpu.reciprocal %30 {approx = true} : vector<8x8x1xf32> -> vector<8x8x1xf32>
    %32 = arith.mulf %30, %31 : vector<8x8x1xf32>
    %cst_9 = arith.constant 2.000000e+00 : f32
    %33 = vector.broadcast %cst_9 : f32 to vector<8x8x1xf32>
    %34 = arith.subf %33, %32 : vector<8x8x1xf32>
    %35 = arith.mulf %31, %34 : vector<8x8x1xf32>
    %36 = vector.broadcast %35 : vector<8x8x1xf32> to vector<8x8x8xf32>
    %37 = arith.mulf %28, %36 : vector<8x8x8xf32>
    %38 = arith.truncf %37 : vector<8x8x8xf32> to vector<8x8x8xbf16>
    %39 = arith.truncf %20 : vector<8x8x32xf32> to vector<8x8x32xbf16>
    "tpu.trace_start"() <{level = 10 : i32, message = "bqk,bkd->bqd"}> : () -> ()
    %cst_10 = arith.constant dense<0.000000e+00> : vector<8x8x32xf32>
    %40 = tpu.matmul %38, %39, %cst_10 {dimension_numbers = #tpu.dot_dimension_numbers<[2], [1], [1], [2], [0, 0, 0, 1, 1, 2], [0], [0]>} : vector<8x8x8xbf16>, vector<8x8x32xbf16>, vector<8x8x32xf32> -> vector<8x8x32xf32>
    "tpu.trace_stop"() : () -> ()
    %41 = vector.shape_cast %40 : vector<8x8x32xf32> to vector<2x4x8x32xf32>
    %42 = tpu.transpose %41, [0, 2, 1, 3] : vector<2x4x8x32xf32> -> vector<2x8x4x32xf32>
    %43 = vector.shape_cast %42 : vector<2x8x4x32xf32> to vector<16x128xf32>
    %44 = arith.truncf %43 : vector<16x128xf32> to vector<16x128xbf16>
    %c0_11 = arith.constant 0 : index
    %c0_12 = arith.constant 0 : index
    %45 = vector.load %arg3[%c0_11, %c0_12] : memref<128x128xbf16, #tpu.memory_space<vmem>>, vector<128x128xbf16>
    %cst_13 = arith.constant dense<0.000000e+00> : vector<16x128xf32>
    %46 = tpu.matmul %44, %45, %cst_13 {dimension_numbers = #tpu.dot_dimension_numbers<[1], [0], [0], [1], [0, 0, 1, 1], [], []>} : vector<16x128xbf16>, vector<128x128xbf16>, vector<16x128xf32> -> vector<16x128xf32>
    %47 = vector.broadcast %1 : vector<1x128xf32> to vector<16x128xf32>
    %48 = arith.addf %46, %47 : vector<16x128xf32>
    %49 = arith.addf %9, %48 : vector<16x128xf32>
    %cst_14 = arith.constant dense<0.000000e+00> : vector<16xf32>
    %50 = vector.multi_reduction <add>, %49, %cst_14 [1] : vector<16x128xf32> to vector<16xf32>
    %51 = vector.shape_cast %50 : vector<16xf32> to vector<16x1xf32>
    %cst_15 = arith.constant 1.280000e+02 : f32
    %52 = vector.broadcast %cst_15 : f32 to vector<16x1xf32>
    %53 = arith.divf %51, %52 : vector<16x1xf32>
    %54 = vector.broadcast %53 : vector<16x1xf32> to vector<16x128xf32>
    %55 = arith.subf %49, %54 : vector<16x128xf32>
    %56 = arith.mulf %55, %55 : vector<16x128xf32>
    %cst_16 = arith.constant dense<0.000000e+00> : vector<16xf32>
    %57 = vector.multi_reduction <add>, %56, %cst_16 [1] : vector<16x128xf32> to vector<16xf32>
    %58 = vector.shape_cast %57 : vector<16xf32> to vector<16x1xf32>
    %cst_17 = arith.constant 1.280000e+02 : f32
    %59 = vector.broadcast %cst_17 : f32 to vector<16x1xf32>
    %60 = arith.divf %58, %59 : vector<16x1xf32>
    %cst_18 = arith.constant 9.99999996E-13 : f32
    %61 = vector.broadcast %cst_18 : f32 to vector<16x1xf32>
    %62 = arith.addf %60, %61 : vector<16x1xf32>
    %63 = math.rsqrt %62 : vector<16x1xf32>
    %cst_19 = arith.constant 5.000000e-01 : f32
    %64 = vector.broadcast %cst_19 : f32 to vector<16x1xf32>
    %65 = arith.mulf %64, %62 : vector<16x1xf32>
    %66 = arith.mulf %65, %63 : vector<16x1xf32>
    %67 = arith.mulf %66, %63 : vector<16x1xf32>
    %cst_20 = arith.constant 1.500000e+00 : f32
    %68 = vector.broadcast %cst_20 : f32 to vector<16x1xf32>
    %69 = arith.subf %68, %67 : vector<16x1xf32>
    %70 = arith.mulf %63, %69 : vector<16x1xf32>
    %71 = vector.broadcast %70 : vector<16x1xf32> to vector<16x128xf32>
    %72 = arith.mulf %55, %71 : vector<16x128xf32>
    %73 = vector.broadcast %2 : vector<1x128xf32> to vector<16x128xf32>
    %74 = arith.mulf %72, %73 : vector<16x128xf32>
    %75 = vector.broadcast %3 : vector<1x128xf32> to vector<16x128xf32>
    %76 = arith.addf %74, %75 : vector<16x128xf32>
    %77 = arith.truncf %76 : vector<16x128xf32> to vector<16x128xbf16>
    %c0_21 = arith.constant 0 : index
    %c0_22 = arith.constant 0 : index
    %78 = vector.load %arg4[%c0_21, %c0_22] : memref<128x256xbf16, #tpu.memory_space<vmem>>, vector<128x256xbf16>
    %cst_23 = arith.constant dense<0.000000e+00> : vector<16x256xf32>
    %79 = tpu.matmul %77, %78, %cst_23 {dimension_numbers = #tpu.dot_dimension_numbers<[1], [0], [0], [1], [0, 0, 1, 1], [], []>} : vector<16x128xbf16>, vector<128x256xbf16>, vector<16x256xf32> -> vector<16x256xf32>
    %80 = vector.broadcast %7 : vector<1x256xf32> to vector<16x256xf32>
    %81 = arith.addf %79, %80 : vector<16x256xf32>
    %cst_24 = arith.constant 5.000000e-01 : f32
    %82 = vector.broadcast %cst_24 : f32 to vector<16x256xf32>
    %83 = arith.mulf %82, %81 : vector<16x256xf32>
    %cst_25 = arith.constant 0.707106769 : f32
    %84 = vector.broadcast %cst_25 : f32 to vector<16x256xf32>
    %85 = arith.mulf %81, %84 : vector<16x256xf32>
    %cst_26 = arith.constant 0.000000e+00 : f32
    %86 = vector.broadcast %cst_26 : f32 to vector<16x256xf32>
    %87 = arith.cmpf oge, %85, %86 : vector<16x256xf32>
    %cst_27 = arith.constant 1.000000e+00 : f32
    %cst_28 = arith.constant -1.000000e+00 : f32
    %88 = vector.broadcast %cst_27 : f32 to vector<16x256xf32>
    %89 = vector.broadcast %cst_28 : f32 to vector<16x256xf32>
    %90 = arith.select %87, %88, %89 : vector<16x256xi1>, vector<16x256xf32>
    %91 = math.absf %85 : vector<16x256xf32>
    %cst_29 = arith.constant 0.327591091 : f32
    %92 = vector.broadcast %cst_29 : f32 to vector<16x256xf32>
    %93 = arith.mulf %92, %91 : vector<16x256xf32>
    %cst_30 = arith.constant 1.000000e+00 : f32
    %94 = vector.broadcast %cst_30 : f32 to vector<16x256xf32>
    %95 = arith.addf %94, %93 : vector<16x256xf32>
    %96 = tpu.reciprocal %95 {approx = true} : vector<16x256xf32> -> vector<16x256xf32>
    %97 = arith.mulf %95, %96 : vector<16x256xf32>
    %cst_31 = arith.constant 2.000000e+00 : f32
    %98 = vector.broadcast %cst_31 : f32 to vector<16x256xf32>
    %99 = arith.subf %98, %97 : vector<16x256xf32>
    %100 = arith.mulf %96, %99 : vector<16x256xf32>
    %cst_32 = arith.constant 1.06140542 : f32
    %101 = vector.broadcast %cst_32 : f32 to vector<16x256xf32>
    %102 = arith.mulf %101, %100 : vector<16x256xf32>
    %cst_33 = arith.constant -1.45315206 : f32
    %103 = vector.broadcast %cst_33 : f32 to vector<16x256xf32>
    %104 = arith.addf %102, %103 : vector<16x256xf32>
    %105 = arith.mulf %104, %100 : vector<16x256xf32>
    %cst_34 = arith.constant 1.42141378 : f32
    %106 = vector.broadcast %cst_34 : f32 to vector<16x256xf32>
    %107 = arith.addf %105, %106 : vector<16x256xf32>
    %108 = arith.mulf %107, %100 : vector<16x256xf32>
    %cst_35 = arith.constant -0.284496725 : f32
    %109 = vector.broadcast %cst_35 : f32 to vector<16x256xf32>
    %110 = arith.addf %108, %109 : vector<16x256xf32>
    %111 = arith.mulf %110, %100 : vector<16x256xf32>
    %cst_36 = arith.constant 0.254829586 : f32
    %112 = vector.broadcast %cst_36 : f32 to vector<16x256xf32>
    %113 = arith.addf %111, %112 : vector<16x256xf32>
    %114 = arith.mulf %113, %100 : vector<16x256xf32>
    %cst_37 = arith.constant 0.000000e+00 : f32
    %115 = vector.broadcast %cst_37 : f32 to vector<16x256xf32>
    %116 = arith.subf %115, %91 : vector<16x256xf32>
    %117 = arith.mulf %116, %91 : vector<16x256xf32>
    %118 = math.exp %117 : vector<16x256xf32>
    %119 = arith.mulf %114, %118 : vector<16x256xf32>
    %cst_38 = arith.constant 1.000000e+00 : f32
    %120 = vector.broadcast %cst_38 : f32 to vector<16x256xf32>
    %121 = arith.subf %120, %119 : vector<16x256xf32>
    %122 = arith.mulf %90, %121 : vector<16x256xf32>
    %cst_39 = arith.constant 1.000000e+00 : f32
    %123 = vector.broadcast %cst_39 : f32 to vector<16x256xf32>
    %124 = arith.addf %123, %122 : vector<16x256xf32>
    %125 = arith.mulf %83, %124 : vector<16x256xf32>
    %126 = arith.truncf %125 : vector<16x256xf32> to vector<16x256xbf16>
    %c0_40 = arith.constant 0 : index
    %c0_41 = arith.constant 0 : index
    %127 = vector.load %arg5[%c0_40, %c0_41] : memref<256x128xbf16, #tpu.memory_space<vmem>>, vector<256x128xbf16>
    %cst_42 = arith.constant dense<0.000000e+00> : vector<16x128xf32>
    %128 = tpu.matmul %126, %127, %cst_42 {dimension_numbers = #tpu.dot_dimension_numbers<[1], [0], [0], [1], [0, 0, 1, 1], [], []>} : vector<16x256xbf16>, vector<256x128xbf16>, vector<16x128xf32> -> vector<16x128xf32>
    %129 = vector.broadcast %6 : vector<1x128xf32> to vector<16x128xf32>
    %130 = arith.addf %128, %129 : vector<16x128xf32>
    %131 = arith.addf %76, %130 : vector<16x128xf32>
    %cst_43 = arith.constant dense<0.000000e+00> : vector<16xf32>
    %132 = vector.multi_reduction <add>, %131, %cst_43 [1] : vector<16x128xf32> to vector<16xf32>
    %133 = vector.shape_cast %132 : vector<16xf32> to vector<16x1xf32>
    %cst_44 = arith.constant 1.280000e+02 : f32
    %134 = vector.broadcast %cst_44 : f32 to vector<16x1xf32>
    %135 = arith.divf %133, %134 : vector<16x1xf32>
    %136 = vector.broadcast %135 : vector<16x1xf32> to vector<16x128xf32>
    %137 = arith.subf %131, %136 : vector<16x128xf32>
    %138 = arith.mulf %137, %137 : vector<16x128xf32>
    %cst_45 = arith.constant dense<0.000000e+00> : vector<16xf32>
    %139 = vector.multi_reduction <add>, %138, %cst_45 [1] : vector<16x128xf32> to vector<16xf32>
    %140 = vector.shape_cast %139 : vector<16xf32> to vector<16x1xf32>
    %cst_46 = arith.constant 1.280000e+02 : f32
    %141 = vector.broadcast %cst_46 : f32 to vector<16x1xf32>
    %142 = arith.divf %140, %141 : vector<16x1xf32>
    %cst_47 = arith.constant 9.99999996E-13 : f32
    %143 = vector.broadcast %cst_47 : f32 to vector<16x1xf32>
    %144 = arith.addf %142, %143 : vector<16x1xf32>
    %145 = math.rsqrt %144 : vector<16x1xf32>
    %cst_48 = arith.constant 5.000000e-01 : f32
    %146 = vector.broadcast %cst_48 : f32 to vector<16x1xf32>
    %147 = arith.mulf %146, %144 : vector<16x1xf32>
    %148 = arith.mulf %147, %145 : vector<16x1xf32>
    %149 = arith.mulf %148, %145 : vector<16x1xf32>
    %cst_49 = arith.constant 1.500000e+00 : f32
    %150 = vector.broadcast %cst_49 : f32 to vector<16x1xf32>
    %151 = arith.subf %150, %149 : vector<16x1xf32>
    %152 = arith.mulf %145, %151 : vector<16x1xf32>
    %153 = vector.broadcast %152 : vector<16x1xf32> to vector<16x128xf32>
    %154 = arith.mulf %137, %153 : vector<16x128xf32>
    %155 = vector.broadcast %4 : vector<1x128xf32> to vector<16x128xf32>
    %156 = arith.mulf %154, %155 : vector<16x128xf32>
    %157 = vector.broadcast %5 : vector<1x128xf32> to vector<16x128xf32>
    %158 = arith.addf %156, %157 : vector<16x128xf32>
    %159 = vector.shape_cast %158 : vector<16x128xf32> to vector<2x8x128xf32>
    %c0_50 = arith.constant 0 : index
    %c0_51 = arith.constant 0 : index
    %c0_52 = arith.constant 0 : index
    %160 = vector.load %arg7[%c0_50, %c0_51, %c0_52] : memref<2x8x128xf32, #tpu.memory_space<vmem>>, vector<2x8x128xf32>
    tpu.vector_store %arg7[%c0_50, %c0_51, %c0_52], %159 {strides = array<i32>} : memref<2x8x128xf32, #tpu.memory_space<vmem>>, vector<2x8x128xf32>,
    return
  }
  func.func @transform_0(%arg0: i32) -> (i32, i32, i32) {
    %c0_i32 = arith.constant 0 : i32
    %c0_i32_0 = arith.constant 0 : i32
    %c0_i32_1 = arith.constant 0 : i32
    return %arg0, %c0_i32, %c0_i32_0 : i32, i32, i32
  }
  func.func @transform_1(%arg0: i32) -> (i32, i32) {
    %c0_i32 = arith.constant 0 : i32
    %c0_i32_0 = arith.constant 0 : i32
    %c0_i32_1 = arith.constant 0 : i32
    return %c0_i32, %c0_i32_0 : i32, i32
  }
  func.func @transform_2(%arg0: i32) -> (i32, i32) {
    %c0_i32 = arith.constant 0 : i32
    %c0_i32_0 = arith.constant 0 : i32
    %c0_i32_1 = arith.constant 0 : i32
    return %c0_i32, %c0_i32_0 : i32, i32
  }
  func.func @transform_3(%arg0: i32) -> (i32, i32) {
    %c0_i32 = arith.constant 0 : i32
    %c0_i32_0 = arith.constant 0 : i32
    %c0_i32_1 = arith.constant 0 : i32
    return %c0_i32, %c0_i32_0 : i32, i32
  }
  func.func @transform_4(%arg0: i32) -> (i32, i32) {
    %c0_i32 = arith.constant 0 : i32
    %c0_i32_0 = arith.constant 0 : i32
    %c0_i32_1 = arith.constant 0 : i32
    return %c0_i32, %c0_i32_0 : i32, i32
  }
  func.func @transform_5(%arg0: i32) -> (i32, i32) {
    %c0_i32 = arith.constant 0 : i32
    %c0_i32_0 = arith.constant 0 : i32
    %c0_i32_1 = arith.constant 0 : i32
    return %c0_i32, %c0_i32_0 : i32, i32
  }
  func.func @transform_6(%arg0: i32) -> (i32, i32, i32) {
    %c0_i32 = arith.constant 0 : i32
    %c0_i32_0 = arith.constant 0 : i32
    %c0_i32_1 = arith.constant 0 : i32
    return %arg0, %c0_i32, %c0_i32_0 : i32, i32, i32
  }
}

</mosaic_0001>

<bundles_post_ra>
// kernel: _lambda_.1
= control target key start
LH: loop header
LB: loop body
LE: loop exit
PB: predicated region body
PF: predicated region fallthrough
CT: control target
= control target key end

     0   :  { %11 = vsyncpa [#allocation3], 0  ;;  %s4278_s0 = inlined_call_operand.hbm [shape: f32[2,8,128], index: 0, kind: input, shape index: {}]   ;;  %s4279_s1 = inlined_call_operand.hbm [shape: bf16[128,384], index: 1, kind: input, shape index: {}]   ;;  %s4280_s2 = inlined_call_operand.hbm [shape: bf16[128,128], index: 2, kind: input, shape index: {}]   ;;  %s4281_s3 = inlined_call_operand.hbm [shape: bf16[128,256], index: 3, kind: input, shape index: {}]   ;;  %s4282_s4 = inlined_call_operand.hbm [shape: bf16[256,128], index: 4, kind: input, shape index: {}]   ;;  %s4283_s5 = inlined_call_operand.hbm [shape: f32[8,256], index: 5, kind: input, shape index: {}]   ;;  %s4284_s6 = inlined_call_operand.hbm [shape: f32[2,8,128], index: 6, kind: output, shape index: {}]  }
   0x1   :  { %12 = vsyncpa [#allocation6], 0 }
   0x2   :  { %13 = vsyncpa [#allocation9], 0 }
   0x3   :  { %14 = vsyncpa [#allocation12], 0 }
   0x4   :  { %15 = vsyncpa [#allocation4], 0  ;;  %s3717_s21 = smov [#allocation5]  }
   0x5   :  { %s33_s22 = sshll.u32 %s3717_s21, 4  ;;  %s34_s22 = int_to_ptr.vmem [resolvable:$true] %s33_s22 }
   0x6   :  { %s3575_s23 = scalar_lea.vmem %s34_s22, 3072  ;;  %p3580_p1 = scmp.lt.s32.totalorder %s34_s22, %s34_s22 }
   0x7   :  { %p3576_p0 = scmp.ne.s32.totalorder %s34_s22, %s3575_s23  ;;  %p3581_p2 = scmp.lt.s32.totalorder %s3575_s23, %s3575_s23 }
   0x9   :  { %p3582_p3 = por %p3581_p2, %p3580_p1 }
   0xb   :  { %p3583_p4 = pnand %p3582_p3, %p3576_p0 }
   0xd   :  { %3586 = shalt.err (!%p3583_p4)
}
   0xe   :  { %s3718_s24 = smov 192   ;;  %s3719_s25 = smov 12  }
   0xf   :  { %39 = dma.hbm_to_vmem [thread:$0]  %s4279_s1, 3072, %s34_s22, [#allocation6], %s3718_s24, %s3718_s24, %s3719_s25  }
  0x10   :  { %s3720_s28 = smov [#allocation8]   ;;  %s3721_s30 = smov [#allocation2]  }
  0x11   :  { %s57_s29 = sshll.u32 %s3720_s28, 4  ;;  %s21_s7 = sshll.u32 %s3721_s30, 4  ;;  %s58_s29 = int_to_ptr.vmem [resolvable:$true] %s57_s29  ;;  %s22_s7 = int_to_ptr.vmem [resolvable:$true] %s21_s7 }
  0x12   :  { %s3595_s8 = scalar_lea.vmem %s58_s29, 2048  ;;  %p3600_p6 = scmp.lt.s32.totalorder %s58_s29, %s58_s29 }
  0x13   :  { %p3596_p5 = scmp.ne.s32.totalorder %s58_s29, %s3595_s8  ;;  %p3601_p7 = scmp.lt.s32.totalorder %s3595_s8, %s3595_s8 }
  0x15   :  { %p3602_p8 = por %p3601_p7, %p3600_p6 }
  0x17   :  { %p3603_p9 = pnand %p3602_p8, %p3596_p5 }
  0x19   :  { %3606 = shalt.err (!%p3603_p9)
}
  0x1a   :  { %s3722_s9 = smov 128   ;;  %s3723_s10 = smov 8  }
  0x1b   :  { %63 = dma.hbm_to_vmem [thread:$0]  %s4281_s3, 2048, %s58_s29, [#allocation9], %s3722_s9, %s3722_s9, %s3723_s10  }
  0x1c   :  { %s3615_s1 = scalar_lea.vmem %s22_s7, 256  ;;  %p3620_p11 = scmp.lt.s32.totalorder %s22_s7, %s22_s7 }
  0x1d   :  { %p3616_p10 = scmp.ne.s32.totalorder %s22_s7, %s3615_s1  ;;  %p3621_p12 = scmp.lt.s32.totalorder %s3615_s1, %s3615_s1 }
  0x1f   :  { %p3622_p13 = por %p3621_p12, %p3620_p11 }
  0x21   :  { %p3623_p0 = pnand %p3622_p13, %p3616_p10 }
  0x23   :  { %3626 = shalt.err (!%p3623_p0)
}
  0x24   :  { %27 = dma.hbm_to_vmem [thread:$0]  %s4278_s0, 256, %s22_s7, [#allocation3], %s3722_s9, %s3722_s9, %s3723_s10  }
  0x25   :  { %s3724_s15 = smov [#allocation7]  }
  0x26   :  { %s45_s16 = sshll.u32 %s3724_s15, 4  ;;  %s46_s16 = int_to_ptr.vmem [resolvable:$true] %s45_s16 }
  0x27   :  { %s3635_s17 = scalar_lea.vmem %s46_s16, 1024  ;;  %p3640_p2 = scmp.lt.s32.totalorder %s46_s16, %s46_s16 }
  0x28   :  { %p3636_p1 = scmp.ne.s32.totalorder %s46_s16, %s3635_s17  ;;  %p3641_p3 = scmp.lt.s32.totalorder %s3635_s17, %s3635_s17 }
  0x2a   :  { %p3642_p4 = por %p3641_p3, %p3640_p2 }
  0x2c   :  { %p3643_p5 = pnand %p3642_p4, %p3636_p1 }
  0x2e   :  { %3646 = shalt.err (!%p3643_p5)
}
  0x2f   :  { %s3725_s3 = smov 64   ;;  %s3726_s18 = smov 4  }
  0x30   :  { %51 = dma.hbm_to_vmem [thread:$0]  %s4280_s2, 1024, %s46_s16, [#allocation6], %s3725_s3, %s3725_s3, %s3726_s18  }
  0x31   :  { %s3727_s21 = smov [#allocation10]   ;;  %s3728_s22 = smov [#allocation11]  }
  0x32   :  { %s69_s0 = sshll.u32 %s3727_s21, 4  ;;  %s82_s23 = sshll.u32 %s3728_s22, 4  ;;  %s70_s0 = int_to_ptr.vmem [resolvable:$true] %s69_s0  ;;  %s83_s23 = int_to_ptr.vmem [resolvable:$true] %s82_s23 }
  0x33   :  { %s3655_s24 = scalar_lea.vmem %s70_s0, 2048  ;;  %p3660_p7 = scmp.lt.s32.totalorder %s70_s0, %s70_s0 }
  0x34   :  { %p3656_p6 = scmp.ne.s32.totalorder %s70_s0, %s3655_s24  ;;  %p3661_p8 = scmp.lt.s32.totalorder %s3655_s24, %s3655_s24 }
  0x36   :  { %p3662_p9 = por %p3661_p8, %p3660_p7 }
  0x38   :  { %p3663_p10 = pnand %p3662_p9, %p3656_p6 }
  0x3a   :  { %3666 = shalt.err (!%p3663_p10)
}
  0x3b   :  { %75 = dma.hbm_to_vmem [thread:$0]  %s4282_s4, 2048, %s70_s0, [#allocation9], %s3725_s3, %s3725_s3, %s3726_s18  }
  0x3c   :  { %s3675_s2 = scalar_lea.vmem %s83_s23, 256  ;;  %p3680_p12 = scmp.lt.s32.totalorder %s83_s23, %s83_s23 }
  0x3d   :  { %p3676_p11 = scmp.ne.s32.totalorder %s83_s23, %s3675_s2  ;;  %p3681_p13 = scmp.lt.s32.totalorder %s3675_s2, %s3675_s2 }
  0x3f   :  { %p3682_p0 = por %p3681_p13, %p3680_p12 }
  0x41   :  { %p3683_p1 = pnand %p3682_p0, %p3676_p11 }
  0x43   :  { %3686 = shalt.err (!%p3683_p1)
}
  0x44   :  { %85 = dma.hbm_to_vmem [thread:$0]  %s4283_s5, 256, %s83_s23, [#allocation12]  }
  0x45   :  { %3707 = dma.done.wait [#allocation3], 256  }
  0x46   :  { %3708 = vsyncadd [#allocation3], 4294967040 }
  0x47   :  { %3709 = dma.done.wait [#allocation6], 4096  }
  0x48   :  { %3710 = vsyncadd [#allocation6], 4294963200 }
  0x49   :  { %3711 = dma.done.wait [#allocation9], 4096  }
  0x4a   :  { %3712 = vsyncadd [#allocation9], 4294963200 }
  0x4b   :  { %3713 = dma.done.wait [#allocation12], 256  }
  0x4c   :  { %3714 = vsyncadd [#allocation12], 4294967040  ;;  %v3729_v0 = vmov 0   ;;  %v3429_v1 = vld [vmem:[#allocation5 + $0xac] ss:$12 sps:$4 sm:$0xff]   ;;  %v107_v17 = vld [vmem:[#allocation2] sm:$0xff]  ;;  %v419_v35 = vlaneseq }
  0x4d   :  { %302 = vmatprep.mubr.bf16.mxu0 %v3729_v0  ;;  %v3431_v2 = vld [vmem:[#allocation5 + $0xa8] ss:$12 sps:$4 sm:$0xff]   ;;  %270 = vmatprep.subr.bf16.mxu0 %v3429_v1  ;;  %v3434_v4 = vld [vmem:[#allocation5 + $0x90] ss:$12 sps:$4 sm:$0xff]   ;;  %v3437_v6 = vld [vmem:[#allocation5 + $0x78] ss:$12 sps:$4 sm:$0xff]  }
  0x4e   :  { %v3432_v3 = vld [vmem:[#allocation5 + $0x94] ss:$12 sps:$4 sm:$0xff]   ;;  %271 = vmatpush1.bf16.msra.mxu0 %v3431_v2  ;;  %v3435_v5 = vld [vmem:[#allocation5 + $0x7c] ss:$12 sps:$4 sm:$0xff]   ;;  %v3438_v7 = vld [vmem:[#allocation5 + $0x64] ss:$12 sps:$4 sm:$0xff]  }
  0x4f   :  { %272 = vmatprep.subr.bf16.mxu0 %v3432_v3  ;;  %v3440_v8 = vld [vmem:[#allocation5 + $0x60] ss:$12 sps:$4 sm:$0xff]   ;;  %v3443_v10 = vld [vmem:[#allocation5 + $0x48] ss:$12 sps:$4 sm:$0xff]   ;;  %v3446_v12 = vld [vmem:[#allocation5 + $0x30] ss:$12 sps:$4 sm:$0xff]  }
  0x50   :  { %v3441_v9 = vld [vmem:[#allocation5 + $0x4c] ss:$12 sps:$4 sm:$0xff]   ;;  %v3444_v11 = vld [vmem:[#allocation5 + $0x34] ss:$12 sps:$4 sm:$0xff]   ;;  %v3447_v13 = vld [vmem:[#allocation5 + $0x1c] ss:$12 sps:$4 sm:$0xff]  }
  0x51   :  { %v3449_v14 = vld [vmem:[#allocation5 + $0x18] ss:$12 sps:$4 sm:$0xff]   ;;  %v3452_v16 = vld [vmem:[#allocation5] ss:$12 sps:$4 sm:$0xff]   ;;  %v3453_v20 = vld [vmem:[#allocation5 + $0xb0] ss:$12 sps:$4 sm:$0xff]  }
  0x52   :  { %273 = vmatpush1.bf16.msra.mxu0 %v3434_v4  ;;  %v3450_v15 = vld [vmem:[#allocation5 + $0x4] ss:$12 sps:$4 sm:$0xff]   ;;  %v108_v18 = vld [vmem:[#allocation2 + $0x8] sm:$0xff]  ;;  %v3730_v21 = vmov 0.0   ;;  %v3455_v23 = vld [vmem:[#allocation5 + $0x80] ss:$12 sps:$4 sm:$0xff]  }
  0x53   :  { %274 = vmatprep.subr.bf16.mxu0 %v3435_v5  ;;  %v109_v19 = vpack.c.bf16 %v108_v18, %v107_v17  ;;  %3257 = vmatprep.subr.bf16.mxu1 %v3730_v21  ;;  %v3454_v22 = vld [vmem:[#allocation5 + $0x98] ss:$12 sps:$4 sm:$0xff]   ;;  %v3456_v24 = vld [vmem:[#allocation5 + $0x68] ss:$12 sps:$4 sm:$0xff]   ;;  %v3457_v25 = vld [vmem:[#allocation5 + $0x50] ss:$12 sps:$4 sm:$0xff]  }
  0x54   :  { %3258 = vmatpush3.bf16.msra.mxu1 %v3453_v20  ;;  %v3458_v26 = vld [vmem:[#allocation5 + $0x38] ss:$12 sps:$4 sm:$0xff]   ;;  %v3459_v28 = vld [vmem:[#allocation5 + $0x20] ss:$12 sps:$4 sm:$0xff]   ;;  %s3731_s4 = smov 32   ;;  %s3732_s5 = smov 96  }
  0x55   :  { %3259 = vmatprep.subr.bf16.mxu1 %v3730_v21  ;;  %v3460_v30 = vld [vmem:[#allocation5 + $0x8] ss:$12 sps:$4 sm:$0xff]   ;;  %vm3733_vm0 = vmmov 0   ;;  %v3734_v33 = vmov 1983009808   ;;  %v3845_v39 = vshrl.u32 %v419_v35, 7 }
  0x56   :  { %275 = vmatpush1.bf16.msra.mxu0 %v3437_v6  ;;  %3273 = vmatprep.mubr.msk.bf16.mxu1 %vm3733_vm0, %v3730_v21  ;;  %v417_v34 = vunpack.c.l.s4 %v3734_v33  ;;  %v3735_v36 = vmov 1934713408   ;;  %vm1246_vm1 = vcmask 261120   ;;  %vm1615_vm2 = vcmask 64512   ;;  %s3737_s29 = smov [#allocation13]  }
  0x57   :  { %276 = vmatprep.subr.bf16.mxu0 %v3438_v7  ;;  %v481_v37 = vunpack.c.l.s4 %v3735_v36  ;;  %vm1747_vm3 = vcmask 1043456   ;;  %vm2411_vm4 = vcmask 523264   ;;  %vm2414_vm5 = vcmask 785408   ;;  %s3066_s30 = sshll.u32 %s3737_s29, 4  ;;  %s3067_s30 = int_to_ptr.vmem [resolvable:$true] %s3066_s30 }
  0x58   :  { %3260 = vmatpush3.bf16.msra.mxu1 %v3454_v22  ;;  %v418_v38 = vunpack.c.0.s8 %v417_v34  ;;  %s3687_s7 = scalar_lea.vmem %s3067_s30, 256  ;;  %p3692_p3 = scmp.lt.s32.totalorder %s3067_s30, %s3067_s30 }
  0x59   :  { %3261 = vmatprep.subr.bf16.mxu1 %v3730_v21  ;;  %v482_v42 = vunpack.c.0.s8 %v481_v37  ;;  %p3688_p2 = scmp.ne.s32.totalorder %s3067_s30, %s3687_s7  ;;  %p3693_p4 = scmp.lt.s32.totalorder %s3687_s7, %s3687_s7 }
  0x5a   :  { %277 = vmatpush1.bf16.msra.mxu0 %v3440_v8  ;;  %v3848_v43 = vsub.s32 %v418_v38, %v3845_v39 }
  0x5b   :  { %278 = vmatprep.subr.bf16.mxu0 %v3441_v9  ;;  %v3851_v50 = vsub.s32 %v482_v42, %v3845_v39  ;;  %p3694_p5 = por %p3693_p4, %p3692_p3 }
  0x5c   :  { %3262 = vmatpush3.bf16.msra.mxu1 %v3455_v23 }
  0x5d   :  { %3263 = vmatprep.subr.bf16.mxu1 %v3730_v21  ;;  %p3695_p6 = pnand %p3694_p5, %p3688_p2 }
  0x5e   :  { %279 = vmatpush1.bf16.msra.mxu0 %v3443_v10 }
  0x5f   :  { %280 = vmatprep.subr.bf16.mxu0 %v3444_v11 }
  0x60   :  { %3264 = vmatpush3.bf16.msra.mxu1 %v3456_v24 }
  0x61   :  { %3265 = vmatprep.subr.bf16.mxu1 %v3730_v21 }
  0x62   :  { %281 = vmatpush1.bf16.msra.mxu0 %v3446_v12 }
  0x63   :  { %282 = vmatprep.subr.bf16.mxu0 %v3447_v13 }
  0x64   :  { %3266 = vmatpush3.bf16.msra.mxu1 %v3457_v25 }
  0x65   :  { %3267 = vmatprep.subr.bf16.mxu1 %v3730_v21 }
  0x66   :  { %283 = vmatpush1.bf16.msra.mxu0 %v3449_v14 }
  0x67   :  { %284 = vmatprep.subr.bf16.mxu0 %v3450_v15 }
  0x68   :  { %3268 = vmatpush3.bf16.msra.mxu1 %v3458_v26 }
  0x69   :  { %3269 = vmatprep.subr.bf16.mxu1 %v3730_v21 }
  0x6a   :  { %285 = vmatpush1.bf16.msra.mxu0 %v3452_v16 }
  0x6b   :  { %3301 = vmatprep.subr.bf16.mxu0 %v3730_v21 }
  0x6c   :  { %3270 = vmatpush3.bf16.msra.mxu1 %v3459_v28 }
  0x6d   :  { %303 = vmatmul.mubr.bf16.vlgmr.msra.gmra.mxu0 %v109_v19  ;;  %3271 = vmatprep.subr.bf16.mxu1 %v3730_v21 }
  0x6e   :  { %3303 = vmatprep.mubr.msk.bf16.mxu0 %vm3733_vm0, %v3730_v21 }
  0x70   :  { %3272 = vmatpush3.bf16.msra.mxu1 %v3460_v30 }
  0x71   :  { %3277 = vmatprep.subr.bf16.mxu1 %v3730_v21 }
  0x73   :  { %3274 = vmatmul.mubr.bf16.vlgmr.msra.gmra.mxu1 %v109_v19 }
  0x74   :  { %3279 = vmatprep.mubr.msk.bf16.mxu1 %vm3733_vm0, %v3730_v21 }
 0x12d   :  { %v3810_v27 = vpop.f32.mrf.mxu0 }
 0x12f   :  { %v306_v29 = vpop.f32.mrf.mxu0 }
 0x130   :  { %388 = vrot.lane.b32.xlu1 %v306_v29, %s3731_s4  ;;  %376 = vrot.lane.b32.xlu0 %v306_v29, %s3732_s5 }
 0x131   :  { %v3818_v31 = vpop.f32.mrf.mxu0 }
 0x133   :  { %v3829_v32 = vpop.f32.mrf.mxu0 }
 0x134   :  { %356 = vrot.lane.b32.xlu1 %v3810_v27, %s3732_s5  ;;  %382 = vrot.lane.b32.xlu0 %v306_v29, %s3725_s3 }
 0x138   :  { %368 = vrot.lane.b32.xlu1 %v3810_v27, %s3731_s4  ;;  %362 = vrot.lane.b32.xlu0 %v3810_v27, %s3725_s3 }
 0x13c   :  { %384 = vrot.lane.b32.xlu1 %v3829_v32, %s3725_s3  ;;  %378 = vrot.lane.b32.xlu0 %v3829_v32, %s3732_s5 }
 0x140   :  { %358 = vrot.lane.b32.xlu1 %v3818_v31, %s3732_s5  ;;  %390 = vrot.lane.b32.xlu0 %v3829_v32, %s3731_s4 }
 0x144   :  { %370 = vrot.lane.b32.xlu1 %v3818_v31, %s3731_s4  ;;  %364 = vrot.lane.b32.xlu0 %v3818_v31, %s3725_s3 }
 0x1a2   :  { %v389_v40 = vpop.permute.xlu1 %388  ;;  %v377_v41 = vpop.permute.xlu0 %376 }
 0x1a3   :  { %v462_v44 = vcombine.low %v377_v41, %v389_v40  ;;  %v463_v45 = vcombine.high %v377_v41, %v389_v40 }
 0x1a5   :  { %v470_v51 = vrot.slane %v462_v44, %v3848_v43  ;;  %v477_v52 = vrot.slane %v463_v45, %v3848_v43 }
 0x1a6   :  { %v357_v46 = vpop.permute.xlu1 %356  ;;  %v383_v47 = vpop.permute.xlu0 %382 }
 0x1a7   :  { %v446_v48 = vcombine.low %v306_v29, %v383_v47  ;;  %v447_v49 = vcombine.high %v306_v29, %v383_v47 }
 0x1a9   :  { %v454_v53 = vrot.slane %v446_v48, %v3848_v43  ;;  %v461_v54 = vrot.slane %v447_v49, %v3848_v43 }
 0x1aa   :  { %v369_v55 = vpop.permute.xlu1 %368  ;;  %v363_v56 = vpop.permute.xlu0 %362 }
 0x1ab   :  { %v510_v57 = vcombine.low %v454_v53, %v470_v51  ;;  %v511_v58 = vcombine.high %v454_v53, %v470_v51  ;;  %v526_v59 = vcombine.low %v461_v54, %v477_v52  ;;  %v527_v60 = vcombine.high %v461_v54, %v477_v52 }
 0x1ac   :  { %v430_v61 = vcombine.low %v357_v46, %v369_v55  ;;  %v431_v62 = vcombine.high %v357_v46, %v369_v55  ;;  %v414_v63 = vcombine.low %v3810_v27, %v363_v56  ;;  %v415_v1 = vcombine.high %v3810_v27, %v363_v56 }
 0x1ad   :  { %v518_v2 = vrot.slane %v510_v57, %v3851_v50  ;;  %v525_v3 = vrot.slane %v511_v58, %v3851_v50  ;;  %v534_v4 = vrot.slane %v526_v59, %v3851_v50  ;;  %v541_v5 = vrot.slane %v527_v60, %v3851_v50 }
 0x1ae   :  { %v438_v6 = vrot.slane %v430_v61, %v3848_v43  ;;  %v445_v7 = vrot.slane %v431_v62, %v3848_v43  ;;  %v422_v8 = vrot.slane %v414_v63, %v3848_v43  ;;  %v429_v9 = vrot.slane %v415_v1, %v3848_v43  ;;  %v385_v10 = vpop.permute.xlu1 %384  ;;  %v379_v11 = vpop.permute.xlu0 %378 }
 0x1af   :  { %v3106_v16 = vcombine.low %v518_v2, %v525_v3  ;;  %v3108_v17 = vcombine.high %v518_v2, %v525_v3  ;;  %v3110_v18 = vcombine.low %v534_v4, %v541_v5  ;;  %v650_v26 = vcombine.low %v3829_v32, %v385_v10 }
 0x1b0   :  { %v478_v12 = vcombine.low %v422_v8, %v438_v6  ;;  %v479_v13 = vcombine.high %v422_v8, %v438_v6  ;;  %v494_v14 = vcombine.low %v429_v9, %v445_v7  ;;  %v495_v15 = vcombine.high %v429_v9, %v445_v7 }
 0x1b1   :  { %v651_v27 = vcombine.high %v3829_v32, %v385_v10  ;;  %v3112_v30 = vcombine.high %v534_v4, %v541_v5  ;;  %v658_v36 = vrot.slane %v650_v26, %v3848_v43  ;;  %v3878_v41 = vrot.slane %v3106_v16, %v3848_v43 }
 0x1b2   :  { %v486_v19 = vrot.slane %v478_v12, %v3851_v50  ;;  %v493_v20 = vrot.slane %v479_v13, %v3851_v50  ;;  %v502_v22 = vrot.slane %v494_v14, %v3851_v50  ;;  %v509_v23 = vrot.slane %v495_v15, %v3851_v50  ;;  %v359_v24 = vpop.permute.xlu1 %358  ;;  %v391_v25 = vpop.permute.xlu0 %390 }
 0x1b3   :  { %v666_v28 = vcombine.low %v379_v11, %v391_v25  ;;  %v667_v29 = vcombine.high %v379_v11, %v391_v25  ;;  %v665_v37 = vrot.slane %v651_v27, %v3848_v43  ;;  %v3881_v42 = vrot.slane %v3108_v17, %v3848_v43 }
 0x1b4   :  { %v3105_v33 = vcombine.low %v486_v19, %v493_v20  ;;  %v3107_v34 = vcombine.high %v486_v19, %v493_v20  ;;  %v3109_v35 = vcombine.low %v502_v22, %v509_v23  ;;  %v3884_v32 = vrot.slane %v3110_v18, %v3848_v43 }
 0x1b5   :  { %v674_v38 = vrot.slane %v666_v28, %v3848_v43  ;;  %v681_v40 = vrot.slane %v667_v29, %v3848_v43  ;;  %v3111_v44 = vcombine.high %v502_v22, %v509_v23  ;;  %v3887_v52 = vrot.slane %v3112_v30, %v3848_v43 }
 0x1b6   :  { %v371_v49 = vpop.permute.xlu1 %370  ;;  %v365_v51 = vpop.permute.xlu0 %364  ;;  %v3890_v53 = vrot.slane %v3105_v33, %v3848_v43  ;;  %v3893_v54 = vrot.slane %v3107_v34, %v3848_v43  ;;  %v3896_v55 = vrot.slane %v3109_v35, %v3848_v43  ;;  %v902_v18 = vcombine.low %v3878_v41, %v3881_v42 }
 0x1b7   :  { %v714_v45 = vcombine.low %v658_v36, %v674_v38  ;;  %v715_v46 = vcombine.high %v658_v36, %v674_v38  ;;  %v730_v47 = vcombine.low %v665_v37, %v681_v40  ;;  %v731_v48 = vcombine.high %v665_v37, %v681_v40 }
 0x1b8   :  { %v634_v60 = vcombine.low %v359_v24, %v371_v49  ;;  %v635_v61 = vcombine.high %v359_v24, %v371_v49  ;;  %v618_v62 = vcombine.low %v3818_v31, %v365_v51  ;;  %v619_v63 = vcombine.high %v3818_v31, %v365_v51 }
 0x1b9   :  { %v722_v56 = vrot.slane %v714_v45, %v3851_v50  ;;  %v729_v57 = vrot.slane %v715_v46, %v3851_v50  ;;  %v738_v58 = vrot.slane %v730_v47, %v3851_v50  ;;  %v745_v59 = vrot.slane %v731_v48, %v3851_v50 }
 0x1ba   :  { %v3905_v1 = vrot.slane %v3111_v44, %v3848_v43  ;;  %v642_v5 = vrot.slane %v634_v60, %v3848_v43  ;;  %v649_v6 = vrot.slane %v635_v61, %v3848_v43  ;;  %v626_v7 = vrot.slane %v618_v62, %v3848_v43 }
 0x1bb   :  { %v3116_v2 = vcombine.low %v722_v56, %v729_v57  ;;  %v3118_v3 = vcombine.high %v722_v56, %v729_v57  ;;  %v3120_v4 = vcombine.low %v738_v58, %v745_v59  ;;  %v633_v8 = vrot.slane %v619_v63, %v3848_v43 }
 0x1bc   :  { %v886_v9 = vcombine.low %v3890_v53, %v3893_v54  ;;  %v3122_v11 = vcombine.high %v738_v58, %v745_v59  ;;  %v682_v12 = vcombine.low %v626_v7, %v642_v5  ;;  %v683_v13 = vcombine.high %v626_v7, %v642_v5 }
 0x1bd   :  { %v1041_v10 = vrot.slane %v3116_v2, %v3848_v43  ;;  %v1057_v31 = vrot.slane %v3118_v3, %v3848_v43  ;;  %v698_v14 = vcombine.low %v633_v8, %v649_v6  ;;  %v699_v15 = vcombine.high %v633_v8, %v649_v6 }
 0x1be   :  { %v918_v16 = vcombine.low %v3896_v55, %v3905_v1  ;;  %v1073_v17 = vrot.slane %v3120_v4, %v3848_v43  ;;  %v934_v19 = vcombine.low %v3884_v32, %v3887_v52  ;;  %v690_v20 = vrot.slane %v682_v12, %v3851_v50 }
 0x1bf   :  { %v697_v22 = vrot.slane %v683_v13, %v3851_v50  ;;  %v706_v23 = vrot.slane %v698_v14, %v3851_v50  ;;  %v713_v24 = vrot.slane %v699_v15, %v3851_v50  ;;  %v1089_v25 = vrot.slane %v3122_v11, %v3848_v43 }
 0x1c0   :  { %v910_v26 = vrot.slane %v902_v18, %v3851_v50  ;;  %v942_v27 = vrot.slane %v934_v19, %v3851_v50  ;;  %v1106_v28 = vcombine.low %v1041_v10, %v1057_v31  ;;  %v894_v36 = vrot.slane %v886_v9, %v3851_v50 }
 0x1c1   :  { %v3115_v29 = vcombine.low %v690_v20, %v697_v22  ;;  %v3117_v30 = vcombine.high %v690_v20, %v697_v22  ;;  %v3119_v33 = vcombine.low %v706_v23, %v713_v24  ;;  %v3121_v34 = vcombine.high %v706_v23, %v713_v24 }
 0x1c2   :  { %v954_v35 = vcombine.low %v910_v26, %v942_v27  ;;  %v926_v46 = vrot.slane %v918_v16, %v3851_v50  ;;  %v3936_v47 = vrot.slane %v1106_v28, %v3851_v50  ;;  %v1138_v48 = vcombine.low %v1073_v17, %v1089_v25 }
 0x1c3   :  { %v1034_v37 = vrot.slane %v3115_v29, %v3848_v43  ;;  %v1050_v38 = vrot.slane %v3117_v30, %v3848_v43  ;;  %v1066_v40 = vrot.slane %v3119_v33, %v3848_v43  ;;  %v1082_v44 = vrot.slane %v3121_v34, %v3848_v43 }
 0x1c4   :  { %v1238_v45 = vpack.c.bf16 %v954_v35, %v954_v35  ;;  %v955_v56 = vcombine.high %v910_v26, %v942_v27  ;;  %v1146_v58 = vrot.slane %v1138_v48, %v3851_v50  ;;  %v903_v59 = vcombine.high %v3878_v41, %v3881_v42 }
 0x1c5   :  { %v1090_v49 = vcombine.low %v1034_v37, %v1050_v38  ;;  %v1122_v51 = vcombine.low %v1066_v40, %v1082_v44  ;;  %v935_v60 = vcombine.high %v3884_v32, %v3887_v52  ;;  %v950_v61 = vcombine.low %v894_v36, %v926_v46 }
 0x1c6   :  { %v1251_v57 = vsel %vm1246_vm1, %v1238_v45, 0  ;;  %v1158_v62 = vcombine.low %v3936_v47, %v1146_v58  ;;  %v1107_v63 = vcombine.high %v1041_v10, %v1057_v31  ;;  %v1139_v2 = vcombine.high %v1073_v17, %v1089_v25 }
 0x1c7   :  { %3278 = vmatpush3.bf16.xpose.msra.mxu1 %v1251_v57  ;;  %v1239_v3 = vpack.c.bf16 %v955_v56, %v955_v56  ;;  %v917_v4 = vrot.slane %v903_v59, %v3851_v50  ;;  %v3948_v5 = vrot.slane %v1090_v49, %v3851_v50  ;;  %v1130_v6 = vrot.slane %v1122_v51, %v3851_v50  ;;  %v4003_v49 = vpop.f32.mrf.mxu1 }
 0x1c8   :  { %3283 = vmatprep.subr.bf16.mxu1 %v3730_v21  ;;  %v1242_v7 = vpack.c.bf16 %v1158_v62, %v1158_v62  ;;  %v949_v41 = vrot.slane %v935_v60, %v3851_v50  ;;  %v1121_v42 = vrot.slane %v1107_v63, %v3851_v50  ;;  %v1153_v32 = vrot.slane %v1139_v2, %v3851_v50 }
 0x1c9   :  { %v1230_v52 = vpack.c.bf16 %v950_v61, %v950_v61  ;;  %v1091_v10 = vcombine.high %v1034_v37, %v1050_v38  ;;  %v1123_v31 = vcombine.high %v1066_v40, %v1082_v44  ;;  %v1297_v11 = vsel %vm1246_vm1, %v1239_v3, 0  ;;  %v3275_v51 = vpop.f32.mrf.mxu1 }
 0x1ca   :  { %v1435_v8 = vsel %vm1246_vm1, %v1242_v7, 0  ;;  %v1160_v9 = vcombine.low %v1121_v42, %v1153_v32  ;;  %v956_v12 = vcombine.low %v917_v4, %v949_v41  ;;  %v1154_v13 = vcombine.low %v3948_v5, %v1130_v6 }
 0x1cb   :  { %3302 = vmatpush3.bf16.xpose.msra.mxu0 %v1435_v8  ;;  %v887_v14 = vcombine.high %v3890_v53, %v3893_v54  ;;  %v919_v15 = vcombine.high %v3896_v55, %v3905_v1  ;;  %v951_v16 = vcombine.high %v894_v36, %v926_v46  ;;  %v1105_v20 = vrot.slane %v1091_v10, %v3851_v50  ;;  %v4005_v56 = vpop.f32.mrf.mxu1 }
 0x1cc   :  { %3313 = vmatprep.subr.bf16.mxu0 %v3730_v21  ;;  %v1244_v17 = vpack.c.bf16 %v1160_v9, %v1160_v9  ;;  %v1240_v18 = vpack.c.bf16 %v956_v12, %v956_v12  ;;  %v1234_v19 = vpack.c.bf16 %v1154_v13, %v1154_v13  ;;  %v1137_v22 = vrot.slane %v1123_v31, %v3851_v50 }
 0x1cd   :  { %v1231_v23 = vpack.c.bf16 %v951_v16, %v951_v16  ;;  %v901_v53 = vrot.slane %v887_v14, %v3851_v50  ;;  %v933_v54 = vrot.slane %v919_v15, %v3851_v50  ;;  %v957_v1 = vcombine.high %v917_v4, %v949_v41  ;;  %v3276_v57 = vpop.f32.mrf.mxu1 }
 0x1ce   :  { %3280 = vmatmul.mubr.msk.bf16.vlgmr.msra.gmra.mxu1 %vm1246_vm1, %v1230_v52  ;;  %v1527_v24 = vsel %vm1246_vm1, %v1244_v17, 0  ;;  %v1343_v55 = vsel %vm1246_vm1, %v1240_v18, 0  ;;  %v1156_v25 = vcombine.low %v1105_v20, %v1137_v22  ;;  %v1159_v33 = vcombine.high %v3936_v47, %v1146_v58 }
 0x1cf   :  { %3284 = vmatpush3.bf16.xpose.msra.mxu1 %v1297_v11  ;;  %3285 = vmatprep.mubr.msk.bf16.mxu1 %vm3733_vm0, %v3730_v21  ;;  %v952_v26 = vcombine.low %v901_v53, %v933_v54  ;;  %v1241_v27 = vpack.c.bf16 %v957_v1, %v957_v1  ;;  %v953_v34 = vcombine.high %v901_v53, %v933_v54 }
 0x1d0   :  { %3289 = vmatprep.subr.bf16.mxu1 %v3730_v21  ;;  %v1236_v28 = vpack.c.bf16 %v1156_v25, %v1156_v25  ;;  %v1243_v35 = vpack.c.bf16 %v1159_v33, %v1159_v33  ;;  %v1161_v38 = vcombine.high %v1121_v42, %v1153_v32  ;;  %v1155_v40 = vcombine.high %v3948_v5, %v1130_v6 }
 0x1d1   :  { %v1232_v29 = vpack.c.bf16 %v952_v26, %v952_v26  ;;  %v1389_v30 = vsel %vm1246_vm1, %v1241_v27, 0  ;;  %v1233_v36 = vpack.c.bf16 %v953_v34, %v953_v34  ;;  %v1157_v47 = vcombine.high %v1105_v20, %v1137_v22 }
 0x1d2   :  { %3304 = vmatmul.mubr.msk.bf16.vlgmr.msra.gmra.mxu0 %vm1246_vm1, %v1234_v19  ;;  %v1481_v37 = vsel %vm1246_vm1, %v1243_v35, 0  ;;  %v1245_v44 = vpack.c.bf16 %v1161_v38, %v1161_v38  ;;  %v1235_v45 = vpack.c.bf16 %v1155_v40, %v1155_v40 }
 0x1d3   :  { %3314 = vmatpush3.bf16.xpose.msra.mxu0 %v1527_v24  ;;  %3315 = vmatprep.mubr.msk.bf16.mxu0 %vm3733_vm0, %v3730_v21  ;;  %v1237_v48 = vpack.c.bf16 %v1157_v47, %v1157_v47 }
 0x1d4   :  { %3325 = vmatprep.subr.bf16.mxu0 %v3730_v21  ;;  %v1573_v46 = vsel %vm1246_vm1, %v1245_v44, 0 }
 0x1d6   :  { %3286 = vmatmul.mubr.msk.bf16.vlgmr.msra.gmra.mxu1 %vm1246_vm1, %v1231_v23 }
 0x1d7   :  { %3290 = vmatpush3.bf16.xpose.msra.mxu1 %v1343_v55  ;;  %3291 = vmatprep.mubr.msk.bf16.mxu1 %vm3733_vm0, %v3730_v21 }
 0x1d8   :  { %3295 = vmatprep.subr.bf16.mxu1 %v3730_v21 }
 0x1da   :  { %3316 = vmatmul.mubr.msk.bf16.vlgmr.msra.gmra.mxu0 %vm1246_vm1, %v1236_v28 }
 0x1db   :  { %3327 = vmatprep.mubr.msk.bf16.mxu0 %vm3733_vm0, %v3730_v21 }
 0x1de   :  { %3292 = vmatmul.mubr.msk.bf16.vlgmr.msra.gmra.mxu1 %vm1246_vm1, %v1232_v29 }
 0x1df   :  { %3296 = vmatpush3.bf16.xpose.msra.mxu1 %v1389_v30  ;;  %3297 = vmatprep.mubr.msk.bf16.mxu1 %vm3733_vm0, %v3730_v21 }
 0x1e0   :  { %3307 = vmatprep.subr.bf16.mxu1 %v3730_v21 }
 0x1e6   :  { %3298 = vmatmul.mubr.msk.bf16.vlgmr.msra.gmra.mxu1 %vm1246_vm1, %v1233_v36 }
 0x1e7   :  { %3308 = vmatpush3.bf16.xpose.msra.mxu1 %v1481_v37  ;;  %3309 = vmatprep.mubr.msk.bf16.mxu1 %vm3733_vm0, %v3730_v21 }
 0x1e8   :  { %3319 = vmatprep.subr.bf16.mxu1 %v3730_v21 }
 0x1ee   :  { %3310 = vmatmul.mubr.msk.bf16.vlgmr.msra.gmra.mxu1 %vm1246_vm1, %v1235_v45 }
 0x1ef   :  { %3320 = vmatpush3.bf16.xpose.msra.mxu1 %v1573_v46  ;;  %3321 = vmatprep.mubr.msk.bf16.mxu1 %vm3733_vm0, %v3730_v21 }
 0x1f0   :  { %3331 = vmatprep.subr.bf16.mxu1 %v3730_v21 }
 0x1f6   :  { %3322 = vmatmul.mubr.msk.bf16.vlgmr.msra.gmra.mxu1 %vm1246_vm1, %v1237_v48 }
 0x1f7   :  { %3333 = vmatprep.mubr.msk.bf16.mxu1 %vm3733_vm0, %v3730_v21 }
 0x28e   :  { %v1287_v58 = vpop.f32.mrf.mxu1 }
 0x28f   :  { %v1616_v59 = vsel %vm1615_vm2, %v1287_v58, -inf }
 0x290   :  { %v3281_v60 = vpop.f32.mrf.mxu1  ;;  %1617 = vmax.xlane.f32.xlu0 %v1616_v59 }
 0x292   :  { %v1290_v61 = vpop.f32.mrf.mxu1  ;;  %v1471_v63 = vpop.f32.mrf.mxu0 }
 0x293   :  { %v1628_v7 = vsel %vm1615_vm2, %v1471_v63, -inf }
 0x294   :  { %v3282_v62 = vpop.f32.mrf.mxu1  ;;  %v3305_v3 = vpop.f32.mrf.mxu0 }
 0x296   :  { %v1333_v2 = vpop.f32.mrf.mxu1  ;;  %v1474_v6 = vpop.f32.mrf.mxu0 }
 0x297   :  { %v1619_v4 = vsel %vm1615_vm2, %v1333_v2, -inf }
 0x298   :  { %v3287_v5 = vpop.f32.mrf.mxu1  ;;  %1620 = vmax.xlane.f32.xlu1 %v1619_v4  ;;  %v3306_v42 = vpop.f32.mrf.mxu0 }
 0x29a   :  { %v1336_v41 = vpop.f32.mrf.mxu1  ;;  %v1563_v52 = vpop.f32.mrf.mxu0 }
 0x29b   :  { %v1634_v8 = vsel %vm1615_vm2, %v1563_v52, -inf }
 0x29c   :  { %v3288_v32 = vpop.f32.mrf.mxu1  ;;  %1629 = vmax.xlane.f32.xlu1 %v1628_v7  ;;  %v3317_v10 = vpop.f32.mrf.mxu0 }
 0x29e   :  { %v1379_v9 = vpop.f32.mrf.mxu1  ;;  %v1566_v12 = vpop.f32.mrf.mxu0 }
 0x29f   :  { %v1622_v31 = vsel %vm1615_vm2, %v1379_v9, -inf }
 0x2a0   :  { %v3293_v11 = vpop.f32.mrf.mxu1  ;;  %1623 = vmax.xlane.f32.xlu0 %v1622_v31  ;;  %1635 = vmax.xlane.f32.xlu1 %v1634_v8  ;;  %v3318_v14 = vpop.f32.mrf.mxu0 }
 0x2a2   :  { %v1382_v13 = vpop.f32.mrf.mxu1 }
 0x2a4   :  { %v3294_v15 = vpop.f32.mrf.mxu1 }
 0x2a6   :  { %v1425_v16 = vpop.f32.mrf.mxu1 }
 0x2a7   :  { %v1625_v17 = vsel %vm1615_vm2, %v1425_v16, -inf }
 0x2a8   :  { %v3299_v18 = vpop.f32.mrf.mxu1  ;;  %1626 = vmax.xlane.f32.xlu0 %v1625_v17 }
 0x2aa   :  { %v1428_v19 = vpop.f32.mrf.mxu1 }
 0x2ac   :  { %v3300_v20 = vpop.f32.mrf.mxu1 }
 0x2ae   :  { %v1517_v22 = vpop.f32.mrf.mxu1 }
 0x2af   :  { %v1631_v23 = vsel %vm1615_vm2, %v1517_v22, -inf }
 0x2b0   :  { %1632 = vmax.xlane.f32.xlu0 %v1631_v23  ;;  %v3311_v24 = vpop.f32.mrf.mxu1 }
 0x2b1   :  { %396 = vrot.lane.b32.xlu1 %v4003_v49, %s3732_s5 }
 0x2b2   :  { %v1520_v53 = vpop.f32.mrf.mxu1 }
 0x2b4   :  { %v3312_v54 = vpop.f32.mrf.mxu1 }
 0x2b5   :  { %408 = vrot.lane.b32.xlu1 %v4003_v49, %s3731_s4 }
 0x2b6   :  { %v4018_v55 = vpop.f32.mrf.mxu1 }
 0x2b7   :  { %v1637_v1 = vsel %vm1615_vm2, %v4018_v55, -inf }
 0x2b8   :  { %1638 = vmax.xlane.f32.xlu0 %v1637_v1  ;;  %v3323_v25 = vpop.f32.mrf.mxu1 }
 0x2ba   :  { %v1612_v26 = vpop.f32.mrf.mxu1 }
 0x2bc   :  { %v3324_v27 = vpop.f32.mrf.mxu1 }
 0x2ce   :  { %402 = vrot.lane.b32.xlu0 %v4003_v49, %s3725_s3 }
 0x319   :  { %v1618_v28 = vpop.xlane.xlu0 %1617 }
 0x31a   :  { %v1640_v29 = vsub.f32 %v1287_v58, %v1618_v28 }
 0x31c   :  { %v1648_v30 = vmul.f32 1.442695, %v1640_v29 }
 0x31e   :  { %3509 = vpow2.f32 %v1648_v30 }
 0x321   :  { %v1621_v33 = vpop.xlane.xlu1 %1620 }
 0x322   :  { %v1641_v34 = vsub.f32 %v1333_v2, %v1621_v33 }
 0x324   :  { %v1650_v35 = vmul.f32 1.442695, %v1641_v34 }
 0x325   :  { %v1630_v36 = vpop.xlane.xlu1 %1629 }
 0x326   :  { %3511 = vpow2.f32 %v1650_v35  ;;  %v1644_v37 = vsub.f32 %v1471_v63, %v1630_v36 }
 0x328   :  { %v1656_v38 = vmul.f32 1.442695, %v1644_v37 }
 0x329   :  { %v1624_v40 = vpop.xlane.xlu0 %1623  ;;  %v1636_v44 = vpop.xlane.xlu1 %1635 }
 0x32a   :  { %3513 = vpow2.f32 %v1656_v38  ;;  %v1642_v45 = vsub.f32 %v1379_v9, %v1624_v40  ;;  %v1646_v46 = vsub.f32 %v1563_v52, %v1636_v44 }
 0x32b   :  { %v4024_v47 = vpop.eup %3509 }
 0x32c   :  { %v1652_v48 = vmul.f32 1.442695, %v1642_v45  ;;  %v1660_v51 = vmul.f32 1.442695, %v1646_v46  ;;  %v1664_v57 = vsel %vm1615_vm2, %v4024_v47, 0.0 }
 0x32d   :  { %1665 = vadd.xlane.f32.xlu1 %v1664_v57  ;;  %v397_v6 = vpop.permute.xlu1 %396 }
 0x32e   :  { %3515 = vpow2.f32 %v1652_v48 }
 0x32f   :  { %3517 = vpow2.f32 %v1660_v51 }
 0x331   :  { %v1627_v58 = vpop.xlane.xlu0 %1626  ;;  %v409_v52 = vpop.permute.xlu1 %408 }
 0x332   :  { %v1643_v59 = vsub.f32 %v1425_v16, %v1627_v58  ;;  %v566_v10 = vcombine.low %v397_v6, %v409_v52  ;;  %v567_v31 = vcombine.high %v397_v6, %v409_v52 }
 0x333   :  { %v4028_v60 = vpop.eup %3511 }
 0x334   :  { %v1654_v61 = vmul.f32 1.442695, %v1643_v59  ;;  %v1667_v62 = vsel %vm1615_vm2, %v4028_v60, 0.0  ;;  %v574_v15 = vrot.slane %v566_v10, %v3848_v43  ;;  %v581_v16 = vrot.slane %v567_v31, %v3848_v43 }
 0x335   :  { %1668 = vadd.xlane.f32.xlu0 %v1667_v62 }
 0x336   :  { %3519 = vpow2.f32 %v1654_v61 }
 0x337   :  { %v4032_v63 = vpop.eup %3513 }
 0x338   :  { %v1676_v2 = vsel %vm1615_vm2, %v4032_v63, 0.0 }
 0x339   :  { %1677 = vadd.xlane.f32.xlu1 %v1676_v2  ;;  %v1633_v3 = vpop.xlane.xlu0 %1632 }
 0x33a   :  { %v1645_v4 = vsub.f32 %v1517_v22, %v1633_v3 }
 0x33b   :  { %v4036_v5 = vpop.eup %3515 }
 0x33c   :  { %v4038_v7 = vpop.eup %3517  ;;  %v1658_v41 = vmul.f32 1.442695, %v1645_v4  ;;  %v1670_v42 = vsel %vm1615_vm2, %v4036_v5, 0.0 }
 0x33d   :  { %1671 = vadd.xlane.f32.xlu1 %v1670_v42  ;;  %v1682_v32 = vsel %vm1615_vm2, %v4038_v7, 0.0 }
 0x33e   :  { %3521 = vpow2.f32 %v1658_v41  ;;  %1683 = vadd.xlane.f32.xlu0 %v1682_v32 }
 0x341   :  { %v1639_v8 = vpop.xlane.xlu0 %1638 }
 0x342   :  { %v1647_v2 = vsub.f32 %v4018_v55, %v1639_v8 }
 0x343   :  { %v4044_v9 = vpop.eup %3519 }
 0x344   :  { %v1673_v11 = vsel %vm1615_vm2, %v4044_v9, 0.0  ;;  %v1662_v6 = vmul.f32 1.442695, %v1647_v2 }
 0x345   :  { %1674 = vadd.xlane.f32.xlu0 %v1673_v11  ;;  %v403_v12 = vpop.permute.xlu0 %402 }
 0x346   :  { %v550_v13 = vcombine.low %v4003_v49, %v403_v12  ;;  %v551_v14 = vcombine.high %v4003_v49, %v403_v12  ;;  %3523 = vpow2.f32 %v1662_v6 }
 0x348   :  { %v558_v17 = vrot.slane %v550_v13, %v3848_v43  ;;  %v565_v18 = vrot.slane %v551_v14, %v3848_v43 }
 0x34a   :  { %v582_v19 = vcombine.low %v558_v17, %v574_v15  ;;  %v583_v20 = vcombine.high %v558_v17, %v574_v15  ;;  %v598_v22 = vcombine.low %v565_v18, %v581_v16  ;;  %v599_v23 = vcombine.high %v565_v18, %v581_v16 }
 0x34b   :  { %v4054_v24 = vpop.eup %3521 }
 0x34c   :  { %v590_v53 = vrot.slane %v582_v19, %v3851_v50  ;;  %v597_v54 = vrot.slane %v583_v20, %v3851_v50  ;;  %v606_v49 = vrot.slane %v598_v22, %v3851_v50  ;;  %v613_v1 = vrot.slane %v599_v23, %v3851_v50 }
 0x34d   :  { %v1679_v25 = vsel %vm1615_vm2, %v4054_v24, 0.0 }
 0x34e   :  { %v958_v26 = vcombine.low %v590_v53, %v597_v54  ;;  %v3113_v27 = vcombine.high %v590_v53, %v597_v54  ;;  %v974_v28 = vcombine.low %v606_v49, %v613_v1  ;;  %v3114_v29 = vcombine.high %v606_v49, %v613_v1  ;;  %1680 = vadd.xlane.f32.xlu0 %v1679_v25 }
 0x34f   :  { %404 = vrot.lane.b32.xlu1 %v4005_v56, %s3725_s3 }
 0x350   :  { %v965_v30 = vrot.slane %v958_v26, %v3848_v43  ;;  %v973_v33 = vrot.slane %v3113_v27, %v3848_v43  ;;  %v981_v34 = vrot.slane %v974_v28, %v3848_v43  ;;  %v989_v35 = vrot.slane %v3114_v29, %v3848_v43 }
 0x352   :  { %v990_v36 = vcombine.low %v965_v30, %v973_v33  ;;  %v1006_v37 = vcombine.low %v981_v34, %v989_v35  ;;  %v991_v38 = vcombine.high %v965_v30, %v973_v33  ;;  %v1007_v40 = vcombine.high %v981_v34, %v989_v35 }
 0x353   :  { %v4079_v41 = vpop.eup %3523 }
 0x354   :  { %v998_v44 = vrot.slane %v990_v36, %v3851_v50  ;;  %v1014_v45 = vrot.slane %v1006_v37, %v3851_v50  ;;  %v1005_v46 = vrot.slane %v991_v38, %v3851_v50  ;;  %v1021_v48 = vrot.slane %v1007_v40, %v3851_v50 }
 0x355   :  { %v1685_v55 = vsel %vm1615_vm2, %v4079_v41, 0.0 }
 0x356   :  { %v1022_v51 = vcombine.low %v998_v44, %v1014_v45  ;;  %v1023_v57 = vcombine.high %v998_v44, %v1014_v45  ;;  %v1024_v58 = vcombine.low %v1005_v46, %v1021_v48  ;;  %v1025_v59 = vcombine.high %v1005_v46, %v1021_v48 }
 0x358   :  { %v1736_v61 = vpack.c.bf16 %v1022_v51, %v1022_v51  ;;  %v1737_v62 = vpack.c.bf16 %v1023_v57, %v1023_v57  ;;  %v1738_v15 = vpack.c.bf16 %v1024_v58, %v1024_v58  ;;  %v1739_v53 = vpack.c.bf16 %v1025_v59, %v1025_v59 }
 0x35a   :  { %v1749_v3 = vsel %vm1747_vm3, %v1736_v61, 0  ;;  %v1795_v4 = vsel %vm1747_vm3, %v1737_v62, 0  ;;  %v1841_v22 = vsel %vm1747_vm3, %v1738_v15, 0  ;;  %v1887_v26 = vsel %vm1747_vm3, %v1739_v53, 0 }
 0x35b   :  { %3326 = vmatpush3.bf16.msra.mxu0 %v1749_v3  ;;  %3332 = vmatpush3.bf16.msra.mxu1 %v1795_v4 }
 0x35c   :  { %3337 = vmatprep.subr.bf16.mxu0 %v3730_v21  ;;  %3343 = vmatprep.subr.bf16.mxu1 %v3730_v21 }
 0x364   :  { %398 = vrot.lane.b32.xlu0 %v4005_v56, %s3732_s5 }
 0x373   :  { %1686 = vadd.xlane.f32.xlu1 %v1685_v55 }
 0x384   :  { %410 = vrot.lane.b32.xlu1 %v4005_v56, %s3731_s4 }
 0x3b6   :  { %v1666_v42 = vpop.xlane.xlu1 %1665 }
 0x3b7   :  { %3525 = vrcp.f32 %v1666_v42 }
 0x3be   :  { %v1669_v32 = vpop.xlane.xlu0 %1668 }
 0x3bf   :  { %3527 = vrcp.f32 %v1669_v32 }
 0x3c2   :  { %v4085_v52 = vpop.xlane.xlu1 %1677 }
 0x3c4   :  { %v3526_v8 = vpop.eup %3525 }
 0x3c5   :  { %v1696_v10 = vmul.f32 %v3526_v8, %v1666_v42 }
 0x3c6   :  { %v1672_v31 = vpop.xlane.xlu1 %1671 }
 0x3c7   :  { %v1704_v11 = vsub.f32 2.0, %v1696_v10  ;;  %3529 = vrcp.f32 %v1672_v31  ;;  %v4087_v12 = vpop.xlane.xlu0 %1683 }
 0x3c9   :  { %v1712_v13 = vmul.f32 %v3526_v8, %v1704_v11 }
 0x3cb   :  { %v1720_v14 = vmul.f32 %v4024_v47, %v1712_v13 }
 0x3cc   :  { %v3528_v16 = vpop.eup %3527 }
 0x3cd   :  { %v1728_v17 = vpack.c.bf16 %v1720_v14, %v1720_v14  ;;  %v1697_v18 = vmul.f32 %v3528_v16, %v1669_v32 }
 0x3ce   :  { %v1675_v19 = vpop.xlane.xlu0 %1674 }
 0x3cf   :  { %v1705_v20 = vsub.f32 2.0, %v1697_v18  ;;  %3531 = vrcp.f32 %v1675_v19  ;;  %3328 = vmatmul.mubr.msk.bf16.vlgmr.msra.gmra.mxu0 %vm1615_vm2, %v1728_v17 }
 0x3d0   :  { %3338 = vmatpush3.bf16.msra.mxu0 %v1841_v22  ;;  %3339 = vmatprep.mubr.msk.bf16.mxu0 %vm3733_vm0, %v3730_v21  ;;  %3533 = vrcp.f32 %v4085_v52 }
 0x3d1   :  { %v1713_v23 = vmul.f32 %v3528_v16, %v1705_v20  ;;  %3349 = vmatprep.subr.bf16.mxu0 %v3730_v21 }
 0x3d3   :  { %v1721_v47 = vmul.f32 %v4028_v60, %v1713_v23 }
 0x3d4   :  { %v3530_v54 = vpop.eup %3529 }
 0x3d5   :  { %v1729_v49 = vpack.c.bf16 %v1721_v47, %v1721_v47  ;;  %v1698_v1 = vmul.f32 %v3530_v54, %v1672_v31 }
 0x3d7   :  { %v1706_v25 = vsub.f32 2.0, %v1698_v1  ;;  %3334 = vmatmul.mubr.msk.bf16.vlgmr.msra.gmra.mxu1 %vm1615_vm2, %v1729_v49  ;;  %v1681_v37 = vpop.xlane.xlu0 %1680 }
 0x3d8   :  { %3344 = vmatpush3.bf16.msra.mxu1 %v1887_v26  ;;  %3345 = vmatprep.mubr.msk.bf16.mxu1 %vm3733_vm0, %v3730_v21  ;;  %3535 = vrcp.f32 %v1681_v37 }
 0x3d9   :  { %v1714_v27 = vmul.f32 %v3530_v54, %v1706_v25  ;;  %3355 = vmatprep.subr.bf16.mxu1 %v3730_v21  ;;  %3537 = vrcp.f32 %v4087_v12 }
 0x3db   :  { %v1722_v28 = vmul.f32 %v4036_v5, %v1714_v27  ;;  %v405_v5 = vpop.permute.xlu1 %404  ;;  %v399_v45 = vpop.permute.xlu0 %398 }
 0x3dc   :  { %v3532_v29 = vpop.eup %3531  ;;  %v754_v40 = vcombine.low %v4005_v56, %v405_v5  ;;  %v755_v44 = vcombine.high %v4005_v56, %v405_v5 }
 0x3dd   :  { %v1730_v60 = vpack.c.bf16 %v1722_v28, %v1722_v28  ;;  %v1699_v30 = vmul.f32 %v3532_v29, %v1675_v19  ;;  %v3534_v51 = vpop.eup %3533 }
 0x3de   :  { %v762_v57 = vrot.slane %v754_v40, %v3848_v43  ;;  %v769_v58 = vrot.slane %v755_v44, %v3848_v43  ;;  %v1700_v6 = vmul.f32 %v3534_v51, %v4085_v52 }
 0x3df   :  { %v1707_v33 = vsub.f32 2.0, %v1699_v30  ;;  %3340 = vmatmul.mubr.msk.bf16.vlgmr.msra.gmra.mxu0 %vm1615_vm2, %v1730_v60 }
 0x3e0   :  { %3351 = vmatprep.mubr.msk.bf16.mxu0 %vm3733_vm0, %v3730_v21  ;;  %v1708_v15 = vsub.f32 2.0, %v1700_v6  ;;  %v3466_v6 = vld [vmem:[#allocation7 + $0x10] sm:$0xff]  }
 0x3e1   :  { %v1715_v34 = vmul.f32 %v3532_v29, %v1707_v33 }
 0x3e2   :  { %v1716_v49 = vmul.f32 %v3534_v51, %v1708_v15 }
 0x3e3   :  { %v1723_v35 = vmul.f32 %v4044_v9, %v1715_v34 }
 0x3e5   :  { %v1731_v36 = vpack.c.bf16 %v1723_v35, %v1723_v35  ;;  %v3536_v62 = vpop.eup %3535 }
 0x3e6   :  { %v1701_v10 = vmul.f32 %v3536_v62, %v1681_v37  ;;  %v3538_v18 = vpop.eup %3537 }
 0x3e7   :  { %3346 = vmatmul.mubr.msk.bf16.vlgmr.msra.gmra.mxu1 %vm1615_vm2, %v1731_v36  ;;  %v1702_v1 = vmul.f32 %v3538_v18, %v4087_v12  ;;  %v1724_v36 = vmul.f32 %v4032_v63, %v1716_v49 }
 0x3e8   :  { %3357 = vmatprep.mubr.msk.bf16.mxu1 %vm3733_vm0, %v3730_v21  ;;  %v1709_v19 = vsub.f32 2.0, %v1701_v10 }
 0x3e9   :  { %v1710_v37 = vsub.f32 2.0, %v1702_v1 }
 0x3ea   :  { %v1717_v27 = vmul.f32 %v3536_v62, %v1709_v19 }
 0x3eb   :  { %v1718_v51 = vmul.f32 %v3538_v18, %v1710_v37 }
 0x3ec   :  { %v1725_v5 = vmul.f32 %v4054_v24, %v1717_v27 }
 0x3fc   :  { %v1687_v38 = vpop.xlane.xlu1 %1686 }
 0x3fd   :  { %3539 = vrcp.f32 %v1687_v38 }
 0x400   :  { %v411_v9 = vpop.permute.xlu1 %410 }
 0x401   :  { %v770_v46 = vcombine.low %v399_v45, %v411_v9  ;;  %v771_v48 = vcombine.high %v399_v45, %v411_v9 }
 0x403   :  { %v778_v59 = vrot.slane %v770_v46, %v3848_v43  ;;  %v785_v61 = vrot.slane %v771_v48, %v3848_v43  ;;  %v1732_v48 = vpack.c.bf16 %v1724_v36, %v1724_v36 }
 0x405   :  { %v786_v2 = vcombine.low %v762_v57, %v778_v59  ;;  %v787_v3 = vcombine.high %v762_v57, %v778_v59  ;;  %v802_v56 = vcombine.low %v769_v58, %v785_v61  ;;  %v803_v4 = vcombine.high %v769_v58, %v785_v61 }
 0x406   :  { %v1733_v57 = vpack.c.bf16 %v1725_v5, %v1725_v5  ;;  %v1726_v59 = vmul.f32 %v4038_v7, %v1718_v51  ;;  %v3461_v7 = vld [vmem:[#allocation7 + $0x38] sm:$0xff]  }
 0x407   :  { %v794_v55 = vrot.slane %v786_v2, %v3851_v50  ;;  %v801_v42 = vrot.slane %v787_v3, %v3851_v50  ;;  %v810_v32 = vrot.slane %v802_v56, %v3851_v50  ;;  %v817_v8 = vrot.slane %v803_v4, %v3851_v50  ;;  %v3463_v3 = vld [vmem:[#allocation7 + $0x28] sm:$0xff]   ;;  %v3464_v56 = vld [vmem:[#allocation7 + $0x20] sm:$0xff]   ;;  %v3465_v4 = vld [vmem:[#allocation7 + $0x18] sm:$0xff]  }
 0x408   :  { %v1734_v62 = vpack.c.bf16 %v1726_v59, %v1726_v59 }
 0x409   :  { %v1162_v31 = vcombine.low %v794_v55, %v801_v42  ;;  %v3123_v11 = vcombine.high %v794_v55, %v801_v42  ;;  %v1178_v13 = vcombine.low %v810_v32, %v817_v8  ;;  %v3124_v14 = vcombine.high %v810_v32, %v817_v8 }
 0x40a   :  { %v3540_v22 = vpop.eup %3539 }
 0x40b   :  { %v1169_v16 = vrot.slane %v1162_v31, %v3848_v43  ;;  %v1177_v17 = vrot.slane %v3123_v11, %v3848_v43  ;;  %v1185_v52 = vrot.slane %v1178_v13, %v3848_v43  ;;  %v1193_v20 = vrot.slane %v3124_v14, %v3848_v43 }
 0x40c   :  { %v1703_v28 = vmul.f32 %v3540_v22, %v1687_v38 }
 0x40d   :  { %v1194_v23 = vcombine.low %v1169_v16, %v1177_v17  ;;  %v1195_v47 = vcombine.high %v1169_v16, %v1177_v17  ;;  %v1210_v53 = vcombine.low %v1185_v52, %v1193_v20  ;;  %v1211_v54 = vcombine.high %v1185_v52, %v1193_v20 }
 0x40e   :  { %v1711_v12 = vsub.f32 2.0, %v1703_v28 }
 0x40f   :  { %v1202_v25 = vrot.slane %v1194_v23, %v3851_v50  ;;  %v1209_v26 = vrot.slane %v1195_v47, %v3851_v50  ;;  %v1218_v29 = vrot.slane %v1210_v53, %v3851_v50  ;;  %v1225_v60 = vrot.slane %v1211_v54, %v3851_v50 }
 0x410   :  { %v1719_v58 = vmul.f32 %v3540_v22, %v1711_v12 }
 0x411   :  { %v1226_v30 = vcombine.low %v1202_v25, %v1218_v29  ;;  %v1227_v33 = vcombine.high %v1202_v25, %v1218_v29  ;;  %v1228_v34 = vcombine.low %v1209_v26, %v1225_v60  ;;  %v1229_v35 = vcombine.high %v1209_v26, %v1225_v60 }
 0x412   :  { %v1727_v61 = vmul.f32 %v4079_v41, %v1719_v58  ;;  %v3462_v41 = vld [vmem:[#allocation7 + $0x30] sm:$0xff]  }
 0x413   :  { %v1740_v40 = vpack.c.bf16 %v1226_v30, %v1226_v30  ;;  %v1741_v44 = vpack.c.bf16 %v1227_v33, %v1227_v33  ;;  %v1742_v9 = vpack.c.bf16 %v1228_v34, %v1228_v34  ;;  %v1743_v46 = vpack.c.bf16 %v1229_v35, %v1229_v35 }
 0x414   :  { %v1735_v2 = vpack.c.bf16 %v1727_v61, %v1727_v61 }
 0x415   :  { %v1933_v45 = vsel %vm1747_vm3, %v1740_v40, 0  ;;  %v1979_v38 = vsel %vm1747_vm3, %v1741_v44, 0  ;;  %v2025_v63 = vsel %vm1747_vm3, %v1742_v9, 0  ;;  %v2071_v24 = vsel %vm1747_vm3, %v1743_v46, 0 }
 0x416   :  { %3350 = vmatpush3.bf16.msra.mxu0 %v1933_v45  ;;  %3356 = vmatpush3.bf16.msra.mxu1 %v1979_v38 }
 0x417   :  { %3361 = vmatprep.subr.bf16.mxu0 %v3730_v21  ;;  %3367 = vmatprep.subr.bf16.mxu1 %v3730_v21 }
 0x419   :  { %3352 = vmatmul.mubr.msk.bf16.vlgmr.msra.gmra.mxu0 %vm1615_vm2, %v1732_v48  ;;  %3358 = vmatmul.mubr.msk.bf16.vlgmr.msra.gmra.mxu1 %vm1615_vm2, %v1733_v57 }
 0x41a   :  { %3362 = vmatpush3.bf16.msra.mxu0 %v2025_v63  ;;  %3368 = vmatpush3.bf16.msra.mxu1 %v2071_v24 }
 0x41b   :  { %3363 = vmatprep.mubr.msk.bf16.mxu0 %vm3733_vm0, %v3730_v21  ;;  %3369 = vmatprep.mubr.msk.bf16.mxu1 %vm3733_vm0, %v3730_v21 }
 0x41c   :  { %3373 = vmatprep.subr.bf16.mxu0 %v3730_v21 }
 0x421   :  { %3364 = vmatmul.mubr.msk.bf16.vlgmr.msra.gmra.mxu0 %vm1615_vm2, %v1734_v62  ;;  %3370 = vmatmul.mubr.msk.bf16.vlgmr.msra.gmra.mxu1 %vm1615_vm2, %v1735_v2 }
 0x422   :  { %3389 = vmatprep.mubr.msk.bf16.mxu0 %vm3733_vm0, %v3730_v21  ;;  %2711 = vmatprep.mubr.bf16.mxu1 %v3729_v0 }
 0x423   :  { %3374 = vmatpush3.bf16.msra.mxu0 %v3461_v7 }
 0x424   :  { %3375 = vmatprep.subr.bf16.mxu0 %v3730_v21 }
 0x427   :  { %3376 = vmatpush3.bf16.msra.mxu0 %v3462_v41 }
 0x428   :  { %3377 = vmatprep.subr.bf16.mxu0 %v3730_v21 }
 0x42b   :  { %3378 = vmatpush3.bf16.msra.mxu0 %v3463_v3 }
 0x42c   :  { %3379 = vmatprep.subr.bf16.mxu0 %v3730_v21 }
 0x42f   :  { %3380 = vmatpush3.bf16.msra.mxu0 %v3464_v56 }
 0x430   :  { %3381 = vmatprep.subr.bf16.mxu0 %v3730_v21 }
 0x433   :  { %3382 = vmatpush3.bf16.msra.mxu0 %v3465_v4 }
 0x434   :  { %3383 = vmatprep.subr.bf16.mxu0 %v3730_v21 }
 0x437   :  { %3384 = vmatpush3.bf16.msra.mxu0 %v3466_v6 }
 0x438   :  { %3385 = vmatprep.subr.bf16.mxu0 %v3730_v21 }
 0x48f   :  { %v1785_v0 = vpop.f32.mrf.mxu0 }
 0x491   :  { %v3329_v55 = vpop.f32.mrf.mxu0 }
 0x493   :  { %v1788_v42 = vpop.f32.mrf.mxu0 }
 0x495   :  { %v3330_v32 = vpop.f32.mrf.mxu0 }
 0x497   :  { %v1831_v8 = vpop.f32.mrf.mxu1 }
 0x499   :  { %v3335_v10 = vpop.f32.mrf.mxu1 }
 0x49b   :  { %v1834_v31 = vpop.f32.mrf.mxu1 }
 0x49d   :  { %v3336_v11 = vpop.f32.mrf.mxu1 }
 0x49f   :  { %v1877_v13 = vpop.f32.mrf.mxu0 }
 0x4a0   :  { %v2113_v14 = vcombine.low %v1785_v0, %v1877_v13  ;;  %v2114_v15 = vcombine.high %v1785_v0, %v1877_v13 }
 0x4a1   :  { %v3341_v16 = vpop.f32.mrf.mxu0 }
 0x4a2   :  { %v2121_v23 = vrot.slane %v2113_v14, %v3848_v43  ;;  %v2128_v47 = vrot.slane %v2114_v15, %v3848_v43 }
 0x4a3   :  { %v1880_v17 = vpop.f32.mrf.mxu0 }
 0x4a5   :  { %v3342_v52 = vpop.f32.mrf.mxu0 }
 0x4a7   :  { %v1923_v18 = vpop.f32.mrf.mxu1 }
 0x4a8   :  { %v2129_v19 = vcombine.low %v1831_v8, %v1923_v18  ;;  %v2130_v20 = vcombine.high %v1831_v8, %v1923_v18 }
 0x4a9   :  { %v3347_v22 = vpop.f32.mrf.mxu1 }
 0x4aa   :  { %v2137_v53 = vrot.slane %v2129_v19, %v3848_v43  ;;  %v2144_v54 = vrot.slane %v2130_v20, %v3848_v43 }
 0x4ab   :  { %v1926_v49 = vpop.f32.mrf.mxu1 }
 0x4ac   :  { %v2145_v1 = vcombine.low %v2121_v23, %v2137_v53  ;;  %v2146_v25 = vcombine.high %v2121_v23, %v2137_v53  ;;  %v2161_v26 = vcombine.low %v2128_v47, %v2144_v54  ;;  %v2162_v27 = vcombine.high %v2128_v47, %v2144_v54 }
 0x4ad   :  { %v3348_v28 = vpop.f32.mrf.mxu1 }
 0x4ae   :  { %v2153_v29 = vrot.slane %v2145_v1, %v3851_v50  ;;  %v2160_v60 = vrot.slane %v2146_v25, %v3851_v50  ;;  %v2169_v30 = vrot.slane %v2161_v26, %v3851_v50  ;;  %v2176_v33 = vrot.slane %v2162_v27, %v3851_v50 }
 0x4b0   :  { %v2249_v34 = vcombine.low %v2153_v29, %v2160_v60  ;;  %v3141_v35 = vcombine.high %v2153_v29, %v2160_v60  ;;  %v2265_v36 = vcombine.low %v2169_v30, %v2176_v33  ;;  %v3142_v37 = vcombine.high %v2169_v30, %v2176_v33  ;;  %v3467_v29 = vld [vmem:[#allocation7 + $0x8] sm:$0xff]  }
 0x4b1   :  { %3386 = vmatpush3.bf16.msra.mxu0 %v3467_v29  ;;  %v3475_v29 = vld [vmem:[#allocation8 + $0x50] ss:$8 sps:$4 sm:$0xff]  }
 0x4b2   :  { %v2256_v5 = vrot.slane %v2249_v34, %v3848_v43  ;;  %v2264_v12 = vrot.slane %v3141_v35, %v3848_v43  ;;  %v2272_v40 = vrot.slane %v2265_v36, %v3848_v43  ;;  %v2280_v44 = vrot.slane %v3142_v37, %v3848_v43  ;;  %3387 = vmatprep.subr.bf16.mxu0 %v3730_v21 }
 0x4b4   :  { %v2282_v45 = vcombine.high %v2256_v5, %v2264_v12  ;;  %v2298_v38 = vcombine.high %v2272_v40, %v2280_v44  ;;  %v2281_v9 = vcombine.low %v2256_v5, %v2264_v12  ;;  %v2297_v46 = vcombine.low %v2272_v40, %v2280_v44 }
 0x4b6   :  { %v4172_v48 = vrot.slane %v2282_v45, %v3851_v50  ;;  %v4175_v51 = vrot.slane %v2298_v38, %v3851_v50  ;;  %v4178_v57 = vrot.slane %v2281_v9, %v3851_v50  ;;  %v4181_v58 = vrot.slane %v2297_v46, %v3851_v50  ;;  %v3468_v38 = vld [vmem:[#allocation7] sm:$0xff]  }
 0x4b7   :  { %3388 = vmatpush3.bf16.msra.mxu0 %v3468_v38 }
 0x4b8   :  { %v2315_v63 = vcombine.low %v4172_v48, %v4175_v51  ;;  %v2313_v24 = vcombine.low %v4178_v57, %v4181_v58  ;;  %v2314_v59 = vcombine.high %v4178_v57, %v4181_v58  ;;  %v2316_v61 = vcombine.high %v4172_v48, %v4175_v51 }
 0x4d9   :  { %v1969_v62 = vpop.f32.mrf.mxu0  ;;  %v2015_v2 = vpop.f32.mrf.mxu1 }
 0x4db   :  { %v3353_v7 = vpop.f32.mrf.mxu0  ;;  %v3359_v41 = vpop.f32.mrf.mxu1 }
 0x4dd   :  { %v1972_v3 = vpop.f32.mrf.mxu0  ;;  %v2018_v56 = vpop.f32.mrf.mxu1 }
 0x4df   :  { %v3354_v4 = vpop.f32.mrf.mxu0  ;;  %v3360_v6 = vpop.f32.mrf.mxu1 }
 0x4e1   :  { %v2061_v0 = vpop.f32.mrf.mxu0  ;;  %v2107_v55 = vpop.f32.mrf.mxu1 }
 0x4e2   :  { %v2181_v42 = vcombine.low %v1969_v62, %v2061_v0  ;;  %v2182_v32 = vcombine.high %v1969_v62, %v2061_v0  ;;  %v2197_v8 = vcombine.low %v2015_v2, %v2107_v55  ;;  %v2198_v10 = vcombine.high %v2015_v2, %v2107_v55 }
 0x4e3   :  { %v3365_v31 = vpop.f32.mrf.mxu0  ;;  %v3371_v11 = vpop.f32.mrf.mxu1 }
 0x4e4   :  { %v2189_v13 = vrot.slane %v2181_v42, %v3848_v43  ;;  %v2196_v14 = vrot.slane %v2182_v32, %v3848_v43  ;;  %v2205_v15 = vrot.slane %v2197_v8, %v3848_v43  ;;  %v2212_v16 = vrot.slane %v2198_v10, %v3848_v43  ;;  %v4217_v31 = vld [vmem:[#allocation11] sm:$0xff] }
 0x4e5   :  { %v2064_v17 = vpop.f32.mrf.mxu0  ;;  %v2110_v52 = vpop.f32.mrf.mxu1  ;;  %v2436_v10 = vsub.s32 0, %v3845_v39 }
 0x4e6   :  { %v2213_v18 = vcombine.low %v2189_v13, %v2205_v15  ;;  %v2214_v19 = vcombine.high %v2189_v13, %v2205_v15  ;;  %v2229_v20 = vcombine.low %v2196_v14, %v2212_v16  ;;  %v2230_v22 = vcombine.high %v2196_v14, %v2212_v16  ;;  %v3565_v13 = vld [vmem:[#allocation2] sm:$0xff]  ;;  %v3566_v52 = vld [vmem:[#allocation2 + $0x8] sm:$0xff] }
 0x4e7   :  { %v3366_v23 = vpop.f32.mrf.mxu0  ;;  %v3372_v47 = vpop.f32.mrf.mxu1  ;;  %v2437_v57 = vrot.slane %v4217_v31, %v2436_v10 }
 0x4e8   :  { %v2221_v53 = vrot.slane %v2213_v18, %v3851_v50  ;;  %v2228_v54 = vrot.slane %v2214_v19, %v3851_v50  ;;  %v2237_v49 = vrot.slane %v2229_v20, %v3851_v50  ;;  %v2244_v1 = vrot.slane %v2230_v22, %v3851_v50 }
 0x4ea   :  { %v2317_v25 = vcombine.low %v2221_v53, %v2228_v54  ;;  %v3143_v26 = vcombine.high %v2221_v53, %v2228_v54  ;;  %v2333_v27 = vcombine.low %v2237_v49, %v2244_v1  ;;  %v3144_v28 = vcombine.high %v2237_v49, %v2244_v1  ;;  %v3471_v1 = vld [vmem:[#allocation8 + $0x74] ss:$8 sps:$4 sm:$0xff]  }
 0x4eb   :  { %2679 = vmatprep.subr.bf16.mxu1 %v3471_v1  ;;  %v106_v1 = vld [vmem:[#allocation11 + $0x8] sm:$0xff] }
 0x4ec   :  { %v2324_v60 = vrot.slane %v2317_v25, %v3848_v43  ;;  %v2332_v30 = vrot.slane %v3143_v26, %v3848_v43  ;;  %v2340_v33 = vrot.slane %v2333_v27, %v3848_v43  ;;  %v2348_v34 = vrot.slane %v3144_v28, %v3848_v43  ;;  %v3469_v25 = vld [vmem:[#allocation8 + $0x70] ss:$8 sps:$4 sm:$0xff]   ;;  %v3474_v26 = vld [vmem:[#allocation8 + $0x64] ss:$8 sps:$4 sm:$0xff]   ;;  %v3472_v27 = vld [vmem:[#allocation8 + $0x60] ss:$8 sps:$4 sm:$0xff]  }
 0x4ed   :  { %2680 = vmatpush1.bf16.msra.mxu1 %v3469_v25  ;;  %v3477_v28 = vld [vmem:[#allocation8 + $0x54] ss:$8 sps:$4 sm:$0xff]  }
 0x4ee   :  { %v2350_v35 = vcombine.high %v2324_v60, %v2332_v30  ;;  %v2366_v36 = vcombine.high %v2340_v33, %v2348_v34  ;;  %v2349_v37 = vcombine.low %v2324_v60, %v2332_v30  ;;  %v2365_v5 = vcombine.low %v2340_v33, %v2348_v34  ;;  %2681 = vmatprep.subr.bf16.mxu1 %v3474_v26  ;;  %v3480_v60 = vld [vmem:[#allocation8 + $0x44] ss:$8 sps:$4 sm:$0xff]   ;;  %v3478_v30 = vld [vmem:[#allocation8 + $0x40] ss:$8 sps:$4 sm:$0xff]   ;;  %v3483_v33 = vld [vmem:[#allocation8 + $0x34] ss:$8 sps:$4 sm:$0xff]  }
 0x4ef   :  { %v3481_v34 = vld [vmem:[#allocation8 + $0x30] ss:$8 sps:$4 sm:$0xff]  }
 0x4f0   :  { %v2364_v12 = vrot.slane %v2350_v35, %v3851_v50  ;;  %v2380_v40 = vrot.slane %v2366_v36, %v3851_v50  ;;  %v2357_v44 = vrot.slane %v2349_v37, %v3851_v50  ;;  %v2373_v45 = vrot.slane %v2365_v5, %v3851_v50  ;;  %v3484_v35 = vld [vmem:[#allocation8 + $0x20] ss:$8 sps:$4 sm:$0xff]   ;;  %v3486_v36 = vld [vmem:[#allocation8 + $0x24] ss:$8 sps:$4 sm:$0xff]   ;;  %v3489_v37 = vld [vmem:[#allocation8 + $0x14] ss:$8 sps:$4 sm:$0xff]  }
 0x4f1   :  { %2682 = vmatpush1.bf16.msra.mxu1 %v3472_v27  ;;  %v3487_v5 = vld [vmem:[#allocation8 + $0x10] ss:$8 sps:$4 sm:$0xff]  }
 0x4f2   :  { %v2383_v9 = vcombine.low %v2364_v12, %v2380_v40  ;;  %v2382_v46 = vcombine.high %v2357_v44, %v2373_v45  ;;  %v2381_v48 = vcombine.low %v2357_v44, %v2373_v45  ;;  %v2384_v62 = vcombine.high %v2364_v12, %v2380_v40  ;;  %2683 = vmatprep.subr.bf16.mxu1 %v3477_v28  ;;  %v3492_v12 = vld [vmem:[#allocation8 + $0x4] ss:$8 sps:$4 sm:$0xff]   ;;  %v3490_v40 = vld [vmem:[#allocation8] ss:$8 sps:$4 sm:$0xff]  }
 0x4f4   :  { %v3419_v43 = vpack.i.bf16 %v2383_v9, %v2315_v63  ;;  %v3414_v51 = vpack.i.bf16 %v2382_v46, %v2314_v59  ;;  %v3424_v21 = vpack.i.bf16 %v2384_v62, %v2316_v61 }
 0x4f5   :  { %2684 = vmatpush1.bf16.msra.mxu1 %v3475_v29 }
 0x4f6   :  { %3420 = vrot.lane.b32.xlu1 %v3419_v43, %s3725_s3  ;;  %3415 = vrot.lane.b32.xlu0 %v3414_v51, %s3731_s4 }
 0x4f7   :  { %2685 = vmatprep.subr.bf16.mxu1 %v3480_v60 }
 0x4f9   :  { %2686 = vmatpush1.bf16.msra.mxu1 %v3478_v30 }
 0x4fa   :  { %3425 = vrot.lane.b32.xlu0 %v3424_v21, %s3732_s5  ;;  %2687 = vmatprep.subr.bf16.mxu1 %v3483_v33 }
 0x4fd   :  { %2688 = vmatpush1.bf16.msra.mxu1 %v3481_v34 }
 0x4fe   :  { %2689 = vmatprep.subr.bf16.mxu1 %v3486_v36 }
 0x501   :  { %2690 = vmatpush1.bf16.msra.mxu1 %v3484_v35 }
 0x502   :  { %2691 = vmatprep.subr.bf16.mxu1 %v3489_v37 }
 0x505   :  { %2692 = vmatpush1.bf16.msra.mxu1 %v3487_v5 }
 0x506   :  { %2693 = vmatprep.subr.bf16.mxu1 %v3492_v12 }
 0x509   :  { %2694 = vmatpush1.bf16.msra.mxu1 %v3490_v40 }
 0x568   :  { %v3421_v2 = vpop.permute.xlu1 %3420  ;;  %v3416_v7 = vpop.permute.xlu0 %3415 }
 0x569   :  { %v3418_v41 = vunpack.i.h.bf16 %v3416_v7  ;;  %v3417_v3 = vunpack.i.l.bf16 %v3416_v7  ;;  %v3423_v50 = vunpack.i.h.bf16 %v3421_v2  ;;  %v3422_v56 = vunpack.i.l.bf16 %v3421_v2 }
 0x56b   :  { %v2409_v63 = vsel %vm1246_vm1, %v2313_v24, %v3417_v3  ;;  %v2410_v59 = vsel %vm1246_vm1, %v2381_v48, %v3418_v41 }
 0x56c   :  { %v3426_v4 = vpop.permute.xlu0 %3425  ;;  %v2412_v0 = vsel %vm2411_vm4, %v2409_v63, %v3422_v56  ;;  %v2413_v55 = vsel %vm2411_vm4, %v2410_v59, %v3423_v50  ;;  %v2564_v50 = vsub.s32 1, %v3845_v39 }
 0x56d   :  { %v3428_v6 = vunpack.i.h.bf16 %v3426_v4  ;;  %v3427_v61 = vunpack.i.l.bf16 %v3426_v4 }
 0x56f   :  { %v2415_v42 = vsel %vm2414_vm5, %v2412_v0, %v3427_v61  ;;  %v2416_v32 = vsel %vm2414_vm5, %v2413_v55, %v3428_v6  ;;  %v2565_v6 = vrot.slane %v4217_v31, %v2564_v50  ;;  %v2570_v61 = vsub.s32 2, %v3845_v39 }
 0x570   :  { %v2417_v8 = vpack.c.bf16 %v2416_v32, %v2415_v42 }
 0x571   :  { %v2571_v32 = vrot.slane %v4217_v31, %v2570_v61 }
 0x572   :  { %3390 = vmatmul.mubr.bf16.vlgmr.msra.gmra.mxu0 %v2417_v8 }
 0x632   :  { %v2520_v58 = vpop.f32.mrf.mxu0 }
 0x633   :  { %v2521_v24 = vadd.f32 %v2520_v58, %v2437_v57 }
 0x634   :  { %v3391_v11 = vpop.f32.mrf.mxu0 }
 0x635   :  { %v2527_v14 = vadd.f32 %v3565_v13, %v2521_v24  ;;  %v3493_v24 = vld [vmem:[#allocation10 + $0x78] sm:$0xff]   ;;  %v3495_v13 = vld [vmem:[#allocation10 + $0x70] sm:$0xff]  }
 0x636   :  { %v2523_v15 = vpop.f32.mrf.mxu0  ;;  %v3494_v11 = vld [vmem:[#allocation10 + $0x38] sm:$0xff]   ;;  %3235 = vmatprep.subr.bf16.mxu0 %v3493_v24 }
 0x637   :  { %v2524_v16 = vadd.f32 %v2523_v15, %v2437_v57  ;;  %2529 = vadd.xlane.f32.xlu1 %v2527_v14  ;;  %3236 = vmatpush3.bf16.msra.mxu0 %v3494_v11  ;;  %v3497_v15 = vld [vmem:[#allocation10 + $0x68] sm:$0xff]  }
 0x638   :  { %v3392_v17 = vpop.f32.mrf.mxu0  ;;  %3237 = vmatprep.subr.bf16.mxu0 %v3495_v13 }
 0x639   :  { %v2528_v18 = vadd.f32 %v3566_v52, %v2524_v16  ;;  %v3498_v16 = vld [vmem:[#allocation10 + $0x28] sm:$0xff]   ;;  %v3499_v17 = vld [vmem:[#allocation10 + $0x60] sm:$0xff]  }
 0x63a   :  { %v3500_v52 = vld [vmem:[#allocation10 + $0x20] sm:$0xff]  }
 0x63b   :  { %2531 = vadd.xlane.f32.xlu0 %v2528_v18 }
 0x6c0   :  { %v2530_v19 = vpop.xlane.xlu1 %2529 }
 0x6c1   :  { %v2534_v20 = vmul.f32 0.0078125, %v2530_v19  ;;  %v3502_v19 = vld [vmem:[#allocation10 + $0x18] sm:$0xff]  }
 0x6c3   :  { %v2536_v22 = vsub.f32 %v2527_v14, %v2534_v20  ;;  %v3496_v14 = vld [vmem:[#allocation10 + $0x30] sm:$0xff]  }
 0x6c4   :  { %v2532_v23 = vpop.xlane.xlu0 %2531  ;;  %3238 = vmatpush3.bf16.msra.mxu0 %v3496_v14  ;;  %v3503_v20 = vld [vmem:[#allocation10 + $0x50] sm:$0xff]  }
 0x6c5   :  { %v2535_v47 = vmul.f32 0.0078125, %v2532_v23  ;;  %v2538_v53 = vmul.f32 %v2536_v22, %v2536_v22  ;;  %3239 = vmatprep.subr.bf16.mxu0 %v3497_v15  ;;  %v3505_v23 = vld [vmem:[#allocation10 + $0x48] sm:$0xff]  }
 0x6c7   :  { %v2537_v54 = vsub.f32 %v2528_v18, %v2535_v47  ;;  %2540 = vadd.xlane.f32.xlu0 %v2538_v53  ;;  %v3501_v18 = vld [vmem:[#allocation10 + $0x58] sm:$0xff]   ;;  %v3506_v47 = vld [vmem:[#allocation10 + $0x8] sm:$0xff]   ;;  %v3507_v53 = vld [vmem:[#allocation10 + $0x40] sm:$0xff]  }
 0x6c8   :  { %3240 = vmatpush3.bf16.msra.mxu0 %v3498_v16 }
 0x6c9   :  { %v2539_v49 = vmul.f32 %v2537_v54, %v2537_v54  ;;  %3241 = vmatprep.subr.bf16.mxu0 %v3499_v17 }
 0x6cb   :  { %2542 = vadd.xlane.f32.xlu1 %v2539_v49  ;;  %v2593_v49 = vsub.s32 6, %v3845_v39 }
 0x6cc   :  { %3242 = vmatpush3.bf16.msra.mxu0 %v3500_v52 }
 0x6cd   :  { %3243 = vmatprep.subr.bf16.mxu0 %v3501_v18  ;;  %v2594_v25 = vrot.slane %v4217_v31, %v2593_v49  ;;  %v2598_v26 = vrot.slane %v106_v1, %v2593_v49 }
 0x6d0   :  { %3244 = vmatpush3.bf16.msra.mxu0 %v3502_v19 }
 0x6d1   :  { %3245 = vmatprep.subr.bf16.mxu0 %v3503_v20 }
 0x750   :  { %v2541_v44 = vpop.xlane.xlu0 %2540 }
 0x751   :  { %v2544_v45 = vmul.f32 0.0078125, %v2541_v44 }
 0x753   :  { %v2546_v38 = vadd.f32 1e-12, %v2544_v45 }
 0x754   :  { %v2543_v9 = vpop.xlane.xlu1 %2542 }
 0x755   :  { %3541 = vrsqrt.f32 %v2546_v38  ;;  %v2545_v46 = vmul.f32 0.0078125, %v2543_v9  ;;  %v2550_v43 = vmul.f32 0.5, %v2546_v38 }
 0x757   :  { %v2547_v48 = vadd.f32 1e-12, %v2545_v46 }
 0x759   :  { %3543 = vrsqrt.f32 %v2547_v48  ;;  %v2551_v2 = vmul.f32 0.5, %v2547_v48 }
 0x762   :  { %v3542_v51 = vpop.eup %3541 }
 0x763   :  { %v2552_v62 = vmul.f32 %v3542_v51, %v2550_v43 }
 0x765   :  { %v2554_v21 = vmul.f32 %v3542_v51, %v2552_v62 }
 0x766   :  { %v3544_v7 = vpop.eup %3543 }
 0x767   :  { %v2556_v41 = vsub.f32 1.5, %v2554_v21  ;;  %v2553_v3 = vmul.f32 %v3544_v7, %v2551_v2 }
 0x769   :  { %v2558_v56 = vmul.f32 %v3542_v51, %v2556_v41  ;;  %v2555_v63 = vmul.f32 %v3544_v7, %v2553_v3 }
 0x76b   :  { %v2560_v59 = vmul.f32 %v2558_v56, %v2536_v22  ;;  %v2557_v4 = vsub.f32 1.5, %v2555_v63  ;;  %v3504_v22 = vld [vmem:[#allocation10 + $0x10] sm:$0xff]  }
 0x76c   :  { %3246 = vmatpush3.bf16.msra.mxu0 %v3504_v22 }
 0x76d   :  { %v2559_v0 = vmul.f32 %v3544_v7, %v2557_v4  ;;  %v2566_v42 = vmul.f32 %v2565_v6, %v2560_v59  ;;  %3247 = vmatprep.subr.bf16.mxu0 %v3505_v23 }
 0x76f   :  { %v2561_v55 = vmul.f32 %v2559_v0, %v2537_v54  ;;  %v4224_v10 = vadd.f32 %v2571_v32, %v2566_v42  ;;  %v3508_v54 = vld [vmem:[#allocation10] sm:$0xff]  }
 0x770   :  { %3248 = vmatpush3.bf16.msra.mxu0 %v3506_v47 }
 0x771   :  { %v2567_v8 = vmul.f32 %v2565_v6, %v2561_v55  ;;  %3249 = vmatprep.subr.bf16.mxu0 %v3507_v53 }
 0x773   :  { %v4226_v57 = vadd.f32 %v2571_v32, %v2567_v8 }
 0x774   :  { %3250 = vmatpush3.bf16.msra.mxu0 %v3508_v54 }
 0x775   :  { %v2574_v58 = vpack.c.bf16 %v4226_v57, %v4224_v10 }
 0x777   :  { %2712 = vmatmul.mubr.bf16.vlgmr.msra.gmra.mxu1 %v2574_v58 }
 0x837   :  { %v2713_v27 = vpop.f32.mrf.mxu1 }
 0x838   :  { %v4232_v28 = vadd.f32 %v2713_v27, %v2594_v25 }
 0x839   :  { %v2715_v29 = vpop.f32.mrf.mxu1 }
 0x83a   :  { %v4235_v60 = vmul.f32 0.70710677, %v4232_v28  ;;  %v4237_v30 = vadd.f32 %v2715_v29, %v2598_v26 }
 0x83b   :  { %v2717_v33 = vpop.f32.mrf.mxu1 }
 0x83c   :  { %v2738_v34 = vand.u32 2147483647, %v4235_v60  ;;  %v4241_v35 = vmul.f32 0.70710677, %v4237_v30  ;;  %v4243_v36 = vadd.f32 %v2717_v33, %v2594_v25  ;;  %vm2730_vm6 = vcmp.ge.f32.partialorder %v4235_v60, 0.0 }
 0x83d   :  { %v2719_v37 = vpop.f32.mrf.mxu1 }
 0x83e   :  { %v2742_v5 = vmul.f32 0.3275911, %v2738_v34  ;;  %v2739_v12 = vand.u32 2147483647, %v4241_v35  ;;  %v4247_v40 = vmul.f32 0.70710677, %v4243_v36  ;;  %v4249_v44 = vadd.f32 %v2719_v37, %v2598_v26 }
 0x83f   :  { %v2802_v41 = vsub.f32 0.0, %v2738_v34  ;;  %vm2731_vm7 = vcmp.ge.f32.partialorder %v4241_v35, 0.0 }
 0x840   :  { %v2746_v45 = vadd.f32 1.0, %v2742_v5  ;;  %v2743_v38 = vmul.f32 0.3275911, %v2739_v12  ;;  %v2740_v9 = vand.u32 2147483647, %v4247_v40  ;;  %v2803_v50 = vsub.f32 0.0, %v2739_v12 }
 0x841   :  { %v4253_v46 = vmul.f32 0.70710677, %v4249_v44  ;;  %v2806_v59 = vmul.f32 %v2802_v41, %v2738_v34  ;;  %vm2732_vm8 = vcmp.ge.f32.partialorder %v4247_v40, 0.0 }
 0x842   :  { %3545 = vrcp.f32 %v2746_v45  ;;  %v2747_v48 = vadd.f32 1.0, %v2743_v38  ;;  %v2744_v43 = vmul.f32 0.3275911, %v2740_v9  ;;  %v2804_v6 = vsub.f32 0.0, %v2740_v9 }
 0x843   :  { %v2741_v51 = vand.u32 2147483647, %v4253_v46  ;;  %v2807_v42 = vmul.f32 %v2803_v50, %v2739_v12  ;;  %v2810_v11 = vmul.f32 1.442695, %v2806_v59  ;;  %vm2733_vm9 = vcmp.ge.f32.partialorder %v4253_v46, 0.0 }
 0x844   :  { %3547 = vrcp.f32 %v2747_v48  ;;  %v2748_v62 = vadd.f32 1.0, %v2744_v43  ;;  %v2808_v15 = vmul.f32 %v2804_v6, %v2740_v9 }
 0x845   :  { %v2745_v21 = vmul.f32 0.3275911, %v2741_v51  ;;  %v2805_v58 = vsub.f32 0.0, %v2741_v51  ;;  %v2812_v18 = vmul.f32 1.442695, %v2807_v42 }
 0x846   :  { %3549 = vrcp.f32 %v2748_v62  ;;  %v2814_v54 = vmul.f32 1.442695, %v2808_v15 }
 0x847   :  { %v2749_v2 = vadd.f32 1.0, %v2745_v21  ;;  %v2809_v23 = vmul.f32 %v2805_v58, %v2741_v51 }
 0x849   :  { %3551 = vrcp.f32 %v2749_v2  ;;  %v2816_v33 = vmul.f32 1.442695, %v2809_v23 }
 0x84a   :  { %3553 = vpow2.f32 %v2810_v11 }
 0x84b   :  { %3555 = vpow2.f32 %v2812_v18 }
 0x84c   :  { %3557 = vpow2.f32 %v2814_v54 }
 0x84d   :  { %3559 = vpow2.f32 %v2816_v33 }
 0x84f   :  { %v3546_v7 = vpop.eup %3545 }
 0x850   :  { %v2754_v3 = vmul.f32 %v3546_v7, %v2746_v45 }
 0x851   :  { %v3548_v56 = vpop.eup %3547 }
 0x852   :  { %v2758_v63 = vsub.f32 2.0, %v2754_v3  ;;  %v2755_v4 = vmul.f32 %v3548_v56, %v2747_v48 }
 0x853   :  { %v3550_v61 = vpop.eup %3549 }
 0x854   :  { %v2762_v0 = vmul.f32 %v3546_v7, %v2758_v63  ;;  %v2759_v55 = vsub.f32 2.0, %v2755_v4  ;;  %v2756_v32 = vmul.f32 %v3550_v61, %v2748_v62 }
 0x856   :  { %v2766_v8 = vmul.f32 1.0614054, %v2762_v0  ;;  %v3552_v24 = vpop.eup %3551  ;;  %v2763_v13 = vmul.f32 %v3548_v56, %v2759_v55  ;;  %v2760_v14 = vsub.f32 2.0, %v2756_v32 }
 0x857   :  { %v2757_v17 = vmul.f32 %v3552_v24, %v2749_v2  ;;  %v3554_v63 = vpop.eup %3553 }
 0x858   :  { %v2770_v16 = vadd.f32 -1.4531521, %v2766_v8  ;;  %v2767_v52 = vmul.f32 1.0614054, %v2763_v13  ;;  %v2764_v19 = vmul.f32 %v3550_v61, %v2760_v14  ;;  %v3556_v55 = vpop.eup %3555 }
 0x859   :  { %v2761_v22 = vsub.f32 2.0, %v2757_v17  ;;  %v3558_v58 = vpop.eup %3557  ;;  %v3736_v17 = vmov -1.0  }
 0x85a   :  { %v2774_v20 = vmul.f32 %v2770_v16, %v2762_v0  ;;  %v2771_v47 = vadd.f32 -1.4531521, %v2767_v52  ;;  %v2768_v53 = vmul.f32 1.0614054, %v2764_v19  ;;  %v3560_v16 = vpop.eup %3559  ;;  %v2735_v52 = vsel %vm2731_vm7, 1.0, %v3736_v17 }
 0x85b   :  { %v2765_v1 = vmul.f32 %v3552_v24, %v2761_v22  ;;  %v2736_v22 = vsel %vm2732_vm8, 1.0, %v3736_v17 }
 0x85c   :  { %v2778_v49 = vadd.f32 1.4214138, %v2774_v20  ;;  %v2775_v25 = vmul.f32 %v2771_v47, %v2763_v13  ;;  %v2772_v26 = vadd.f32 -1.4531521, %v2768_v53  ;;  %v2737_v53 = vsel %vm2733_vm9, 1.0, %v3736_v17 }
 0x85d   :  { %v2769_v29 = vmul.f32 1.0614054, %v2765_v1 }
 0x85e   :  { %v2782_v27 = vmul.f32 %v2778_v49, %v2762_v0  ;;  %v2779_v34 = vadd.f32 1.4214138, %v2775_v25  ;;  %v2776_v37 = vmul.f32 %v2772_v26, %v2764_v19  ;;  %v2723_v25 = vmul.f32 0.5, %v4237_v30 }
 0x85f   :  { %v2773_v12 = vadd.f32 -1.4531521, %v2769_v29  ;;  %v2725_v26 = vmul.f32 0.5, %v4249_v44  ;;  %v2722_v29 = vmul.f32 0.5, %v4232_v28 }
 0x860   :  { %v2786_v5 = vadd.f32 -0.28449672, %v2782_v27  ;;  %v2783_v45 = vmul.f32 %v2779_v34, %v2763_v13  ;;  %v2780_v38 = vadd.f32 1.4214138, %v2776_v37 }
 0x861   :  { %v2777_v48 = vmul.f32 %v2773_v12, %v2765_v1 }
 0x862   :  { %v2790_v9 = vmul.f32 %v2786_v5, %v2762_v0  ;;  %v2787_v43 = vadd.f32 -0.28449672, %v2783_v45  ;;  %v2784_v51 = vmul.f32 %v2780_v38, %v2764_v19  ;;  %v2874_v45 = vsub.s32 5, %v3845_v39 }
 0x863   :  { %v2781_v21 = vadd.f32 1.4214138, %v2777_v48 }
 0x864   :  { %v2794_v62 = vadd.f32 0.2548296, %v2790_v9  ;;  %v2791_v2 = vmul.f32 %v2787_v43, %v2763_v13  ;;  %v2788_v7 = vadd.f32 -0.28449672, %v2784_v51 }
 0x865   :  { %v2785_v3 = vmul.f32 %v2781_v21, %v2765_v1 }
 0x866   :  { %v2798_v41 = vmul.f32 %v2794_v62, %v2762_v0  ;;  %v2795_v50 = vadd.f32 0.2548296, %v2791_v2  ;;  %v2792_v56 = vmul.f32 %v2788_v7, %v2764_v19 }
 0x867   :  { %v2789_v59 = vadd.f32 -0.28449672, %v2785_v3 }
 0x868   :  { %v2818_v4 = vmul.f32 %v3554_v63, %v2798_v41  ;;  %v2799_v6 = vmul.f32 %v2795_v50, %v2763_v13  ;;  %v2796_v61 = vadd.f32 0.2548296, %v2792_v56  ;;  %v2734_v13 = vsel %vm2730_vm6, 1.0, %v3736_v17 }
 0x869   :  { %v2793_v42 = vmul.f32 %v2789_v59, %v2765_v1 }
 0x86a   :  { %v2819_v32 = vmul.f32 %v3556_v55, %v2799_v6  ;;  %v2800_v8 = vmul.f32 %v2796_v61, %v2764_v19  ;;  %v2822_v11 = vsub.f32 1.0, %v2818_v4 }
 0x86b   :  { %v2797_v24 = vadd.f32 0.2548296, %v2793_v42 }
 0x86c   :  { %v2823_v0 = vsub.f32 1.0, %v2819_v32  ;;  %v2820_v14 = vmul.f32 %v3558_v58, %v2800_v8  ;;  %v2826_v60 = vmul.f32 %v2822_v11, %v2734_v13  ;;  %v3049_v11 = vsub.s32 3, %v3845_v39 }
 0x86d   :  { %v2801_v15 = vmul.f32 %v2797_v24, %v2765_v1  ;;  %v2724_v1 = vmul.f32 0.5, %v4243_v36  ;;  %v2875_v36 = vrot.slane %v4217_v31, %v2874_v45 }
 0x86e   :  { %v2824_v18 = vsub.f32 1.0, %v2820_v14  ;;  %v2827_v20 = vmul.f32 %v2823_v0, %v2735_v52  ;;  %v2830_v40 = vadd.f32 1.0, %v2826_v60  ;;  %v3050_v52 = vrot.slane %v4217_v31, %v3049_v11 }
 0x86f   :  { %v2821_v19 = vmul.f32 %v3560_v16, %v2801_v15  ;;  %v3055_v16 = vsub.s32 4, %v3845_v39 }
 0x870   :  { %v2828_v23 = vmul.f32 %v2824_v18, %v2736_v22  ;;  %v2831_v54 = vadd.f32 1.0, %v2827_v20  ;;  %v2834_v37 = vmul.f32 %v2830_v40, %v2722_v29 }
 0x871   :  { %v2825_v35 = vsub.f32 1.0, %v2821_v19  ;;  %v3056_v22 = vrot.slane %v4217_v31, %v3055_v16 }
 0x872   :  { %v2832_v47 = vadd.f32 1.0, %v2828_v23  ;;  %v2835_v46 = vmul.f32 %v2831_v54, %v2723_v25 }
 0x873   :  { %v2829_v49 = vmul.f32 %v2825_v35, %v2737_v53 }
 0x874   :  { %v2836_v33 = vmul.f32 %v2832_v47, %v2724_v1 }
 0x875   :  { %v2833_v27 = vadd.f32 1.0, %v2829_v49 }
 0x876   :  { %v2838_v12 = vpack.c.bf16 %v2836_v33, %v2834_v37 }
 0x877   :  { %v2837_v34 = vmul.f32 %v2833_v27, %v2725_v26 }
 0x879   :  { %v2839_v5 = vpack.c.bf16 %v2837_v34, %v2835_v46 }
 0x87b   :  { %3004 = vmatprep.mubr.bf16.mxu0 %v2839_v5 }
 0x87c   :  { %3005 = vmatmul.mubr.bf16.vlgmr.msra.gmra.mxu0 %v2838_v12 }
 0x93c   :  { %v3251_v38 = vpop.f32.mrf.mxu0 }
 0x93e   :  { %v3252_v9 = vpop.f32.mrf.mxu0 }
 0x93f   :  { %v3253_v30 = vadd.f32 %v3252_v9, %v3251_v38 }
 0x940   :  { %v3254_v48 = vpop.f32.mrf.mxu0 }
 0x941   :  { %v3007_v44 = vadd.f32 %v3253_v30, %v2875_v36 }
 0x942   :  { %v3255_v43 = vpop.f32.mrf.mxu0 }
 0x943   :  { %v3256_v51 = vadd.f32 %v3255_v43, %v3254_v48  ;;  %v3013_v28 = vadd.f32 %v3007_v44, %v4224_v10 }
 0x945   :  { %v3010_v62 = vadd.f32 %v3256_v51, %v2875_v36  ;;  %3015 = vadd.xlane.f32.xlu0 %v3013_v28 }
 0x947   :  { %v3014_v21 = vadd.f32 %v3010_v62, %v4226_v57 }
 0x949   :  { %3017 = vadd.xlane.f32.xlu1 %v3014_v21 }
 0x9ce   :  { %v3016_v2 = vpop.xlane.xlu0 %3015 }
 0x9cf   :  { %v3019_v7 = vmul.f32 0.0078125, %v3016_v2 }
 0x9d1   :  { %v3021_v41 = vsub.f32 %v3013_v28, %v3019_v7 }
 0x9d2   :  { %v3018_v3 = vpop.xlane.xlu1 %3017 }
 0x9d3   :  { %v3020_v50 = vmul.f32 0.0078125, %v3018_v3  ;;  %v3023_v56 = vmul.f32 %v3021_v41, %v3021_v41 }
 0x9d5   :  { %v3022_v63 = vsub.f32 %v3014_v21, %v3020_v50  ;;  %3025 = vadd.xlane.f32.xlu0 %v3023_v56 }
 0x9d7   :  { %v3024_v59 = vmul.f32 %v3022_v63, %v3022_v63 }
 0x9d9   :  { %3027 = vadd.xlane.f32.xlu1 %v3024_v59 }
 0xa5e   :  { %v3026_v4 = vpop.xlane.xlu0 %3025 }
 0xa5f   :  { %v3029_v6 = vmul.f32 0.0078125, %v3026_v4 }
 0xa61   :  { %v3031_v61 = vadd.f32 1e-12, %v3029_v6 }
 0xa62   :  { %v3028_v55 = vpop.xlane.xlu1 %3027 }
 0xa63   :  { %3561 = vrsqrt.f32 %v3031_v61  ;;  %v3030_v10 = vmul.f32 0.0078125, %v3028_v55  ;;  %v3035_v57 = vmul.f32 0.5, %v3031_v61 }
 0xa65   :  { %v3032_v42 = vadd.f32 1e-12, %v3030_v10 }
 0xa67   :  { %3563 = vrsqrt.f32 %v3032_v42  ;;  %v3036_v24 = vmul.f32 0.5, %v3032_v42 }
 0xa70   :  { %v3562_v32 = vpop.eup %3561 }
 0xa71   :  { %v3037_v8 = vmul.f32 %v3562_v32, %v3035_v57 }
 0xa73   :  { %v3039_v58 = vmul.f32 %v3562_v32, %v3037_v8 }
 0xa74   :  { %v3564_v0 = vpop.eup %3563 }
 0xa75   :  { %v3041_v14 = vsub.f32 1.5, %v3039_v58  ;;  %v3038_v15 = vmul.f32 %v3564_v0, %v3036_v24 }
 0xa77   :  { %v3043_v17 = vmul.f32 %v3562_v32, %v3041_v14  ;;  %v3040_v13 = vmul.f32 %v3564_v0, %v3038_v15 }
 0xa79   :  { %v3042_v18 = vsub.f32 1.5, %v3040_v13  ;;  %v3045_v20 = vmul.f32 %v3043_v17, %v3021_v41 }
 0xa7b   :  { %v3044_v19 = vmul.f32 %v3564_v0, %v3042_v18  ;;  %v3051_v60 = vmul.f32 %v3050_v52, %v3045_v20 }
 0xa7d   :  { %v3046_v23 = vmul.f32 %v3044_v19, %v3022_v63  ;;  %v3057_v35 = vadd.f32 %v3056_v22, %v3051_v60 }
 0xa7f   :  { %v3052_v47 = vmul.f32 %v3050_v52, %v3046_v23  ;;  %3059 = vst [vmem:[#allocation13] sm:$0xff] %v3057_v35 }
 0xa81   :  { %v3058_v53 = vadd.f32 %v3056_v22, %v3052_v47 }
 0xa83   :  { %3060 = vst [vmem:[#allocation13 + $0x8] sm:$0xff] %v3058_v53 }
 0xa84   :  { %3698 = shalt.err (!%p3695_p6)
}
 0xa85   :  { %3072 = dma.vmem_to_hbm [thread:$0]  %s3067_s30, 256, %s4284_s6, [#allocation4], %s3722_s9, %s3722_s9, %s3723_s10  }
 0xa86   :  { %3715 = dma.done.wait [#allocation4], 256  }
 0xa87   :  { %3716 = vsyncadd [#allocation4], 4294967040 }
 0xa88   :  { %3076 = vsyncpa [#allocation3], 1 }
 0xa89   :  { %3077 = vsyncpa [#allocation6], 1 }
 0xa8a   :  { %3078 = vsyncpa [#allocation9], 1 }
 0xa8b   :  { %3079 = vsyncpa [#allocation12], 1 }
 0xa8c   :  { %3080 = vsyncpa [#allocation4], 1 }

</bundles_post_ra>
